<compile_context>
chip_gen: v6e
topology: v6e:2x2x1
jax: 0.10.0
libtpu: 0.0.40
codegen_flags: <defaults>
</compile_context>

<pallas_src>
import functools

import jax
import jax.numpy as jnp
from jax.experimental import pallas as pl
from jax.experimental.pallas import tpu as pltpu

F_PAD = 128     # lane-dense feature width (last / fast axis)
N_ALIGN = 128   # node-dim padding: lane-dense A rows + full MXU K tile for A@H


def _round_up(x, m):
    return ((x + m - 1) // m) * m


def pack_graphnet_params(params, f_pad=F_PAD):
    """One-time packing of per-layer (W, b) into lane-dense stacked slabs.

    Zero padding is exact: padded rows/cols of W and padded bias lanes are 0, so
    padded feature columns stay identically 0 through every (linear) layer and
    through the |.| epilogue.
    """
    layer_dims = tuple((int(w.shape[0]), int(w.shape[1])) for w, _ in params)
    assert max(max(d) for d in layer_dims) <= f_pad
    w_stack = jnp.stack([
        jnp.zeros((f_pad, f_pad), jnp.float32).at[:fi, :fo].set(w.astype(jnp.float32))
        for (w, _), (fi, fo) in zip(params, layer_dims)
    ])
    b_stack = jnp.stack([
        jnp.zeros((1, f_pad), jnp.float32).at[0, :fo].set(b.astype(jnp.float32))
        for (_, b), (_, fo) in zip(params, layer_dims)
    ])
    return w_stack, b_stack


def pad_graph_inputs(a_hat, h0, n_align=N_ALIGN, f_pad=F_PAD):
    """One-time (per-graph) zero padding of A_hat and the node features."""
    n = a_hat.shape[0]
    n_pad = _round_up(max(n, 1), n_align)
    a_p = jnp.zeros((n_pad, n_pad), jnp.float32).at[:n, :n].set(a_hat.astype(jnp.float32))
    h_p = jnp.zeros((n_pad, f_pad), jnp.float32).at[:n, : h0.shape[1]].set(
        h0.astype(jnp.float32))
    return a_p, h_p


@functools.partial(jax.jit, static_argnames=("n", "input_dims", "compute_dtype"))
def graphnet_forward(a_p, h_p, w_stack, b_stack, *, n, input_dims,
                     compute_dtype="float32"):
    """Fused forward over all 2*L GraphConv layers in a single pallas_call.

    a_p:     (n_pad, n_pad) padded normalized adjacency  (n_pad % 128 == 0)
    h_p:     (n_pad, F_PAD) padded node features
    w_stack: (2L, F_PAD, F_PAD) zero-padded weights
    b_stack: (2L, 1, F_PAD)     zero-padded biases
    """
    n_pad, f_pad = h_p.shape
    num_layers = w_stack.shape[0]
    cdt = jnp.bfloat16 if compute_dtype == "bfloat16" else jnp.float32

    def kernel(a_ref, h_ref, w_ref, b_ref, o_ref):
        # A_hat is DMA'd to VMEM once; the running H never leaves VMEM/vregs
        # between layers (no per-layer HBM round trips, one fused dispatch).
        a = a_ref[...].astype(cdt)     # matmul-operand dtype (f32 or bf16), hoisted
        h = h_ref[...]                 # running features, kept in f32
        for i in range(num_layers):    # fully unrolled: num_layers is static
            w = w_ref[i].astype(cdt)   # (f_pad, f_pad), static index -> plain load
            # Fixed project-first order, same as the pure-JAX reference:
            #   H <- A_hat @ (H @ W) + b ; MXU accumulates in f32 either way.
            hw = jnp.dot(h.astype(cdt), w, preferred_element_type=jnp.float32)
            h = jnp.dot(a, hw.astype(cdt), preferred_element_type=jnp.float32) + b_ref[i]
            # NOTE: padded node rows (n..n_pad-1) pick up the bias here, but A's
            # padded columns are all zero, so they can never feed back into real
            # rows; the wrapper slices the output to [:n] regardless.
        # Final nn.LeakyReLU(-1.0) == abs; single f32 VPU pass fused into the
        # lane-dense (128-wide) HBM store.
        o_ref[...] = jnp.abs(h).astype(o_ref.dtype)

    # Everything (A, H, W, b, out) is resident in VMEM for the whole call.
    slab_bytes = (a_p.size + h_p.size + w_stack.size + b_stack.size + n_pad * f_pad) * 4
    vmem_limit = int(max(16 << 20, 4 * slab_bytes))   # explicit budget + headroom

    out_p = pl.pallas_call(
        kernel,
        out_shape=jax.ShapeDtypeStruct((n_pad, f_pad), jnp.float32),
        grid=(1,),
        in_specs=[
            pl.BlockSpec((n_pad, n_pad), lambda i: (0, 0)),
            pl.BlockSpec((n_pad, f_pad), lambda i: (0, 0)),
            pl.BlockSpec((num_layers, f_pad, f_pad), lambda i: (0, 0, 0)),
            pl.BlockSpec((num_layers, 1, f_pad), lambda i: (0, 0, 0)),
        ],
        out_specs=pl.BlockSpec((n_pad, f_pad), lambda i: (0, 0)),
        compiler_params=pltpu.CompilerParams(
            dimension_semantics=("arbitrary",),
            vmem_limit_bytes=vmem_limit,
        ),
    )(a_p, h_p, w_stack, b_stack)

    # TODO(synk): for graphs where A_hat no longer fits VMEM (N ~ few thousand),
    # switch A to memory_space=pl.ANY and stream it per layer (emit_pipeline or a
    # row-block "parallel" node axis), keeping H in persistent VMEM scratch.

    # Strip node / feature padding (padded rows/cols never affect real ones).
    return out_p[:n, :input_dims]


def build_graphnet_params(feature_dims, input_dims, key):
    """Parameter init matching GraphNet layer shapes.

    Encoder: input_dims -> f0 -> ... -> f_{L-1}
    Decoder (feature_dims reversed): f_{L-1} -> ... -> f0 -> input_dims
    GraphConv weight: (in_feats, out_feats) xavier-uniform; bias: zeros.
    """
    dims_fwd = [input_dims] + list(feature_dims)
    dims_rev = list(reversed(feature_dims)) + [input_dims]
    layer_dims = list(zip(dims_fwd[:-1], dims_fwd[1:])) + list(
        zip(dims_rev[:-1], dims_rev[1:])
    )
    params = []
    for (fi, fo) in layer_dims:
        key, sub = jax.random.split(key)
        limit = (6.0 / (fi + fo)) ** 0.5
        w = jax.random.uniform(sub, (fi, fo), jnp.float32, -limit, limit)
        b = jnp.zeros((fo,), jnp.float32)
        params.append((w, b))
    return params


def build_normalized_adjacency(n):
    """Deterministic small graph (ring + self-loops), DGL norm='both' adjacency.

    A[dst, src] = 1 for edge src->dst;  A_hat = D_in^{-1/2} A D_out^{-1/2}.
    (Degrees clipped to >=1; the test graph has no zero-degree nodes anyway.)
    """
    a = jnp.zeros((n, n), jnp.float32)
    idx = jnp.arange(n)
    a = a.at[idx, idx].set(1.0)                 # self loops
    a = a.at[(idx + 1) % n, idx].set(1.0)       # ring edges i -> i+1
    a = a.at[(idx - 1) % n, idx].set(1.0)       # ring edges i -> i-1
    deg_in = jnp.clip(a.sum(axis=1), 1.0, None)
    deg_out = jnp.clip(a.sum(axis=0), 1.0, None)
    return (deg_in ** -0.5)[:, None] * a * (deg_out ** -0.5)[None, :]


if __name__ == "__main__":
    key = jax.random.PRNGKey(0)
    k_feat, k_param = jax.random.split(key)

    N = 16               # number of graph nodes
    INPUT_DIMS = 1       # GraphNet(input_dims=1) default
    FEATURE_DIMS = [8, 16, 32]

    # Node feature 'broad_neu_energy': (N, input_dims)
    h0 = jax.random.normal(k_feat, (N, INPUT_DIMS), jnp.float32)
    a_hat = build_normalized_adjacency(N)
    params = build_graphnet_params(FEATURE_DIMS, INPUT_DIMS, k_param)

    # One-time setup, hoisted out of the per-call path (perf review item #1).
    w_stack, b_stack = pack_graphnet_params(params)
    a_p, h_p = pad_graph_inputs(a_hat, h0)
    jax.block_until_ready((a_p, h_p, w_stack, b_stack))

    # f32 matmul path: compared against the pure-JAX reference at tight tolerance.
    out = graphnet_forward(a_p, h_p, w_stack, b_stack, n=N, input_dims=INPUT_DIMS)
    jax.block_until_ready(out)

    # Pure-JAX reference for the same forward pass (same project-first order).
    ref = h0
    for w, b in params:
        ref = a_hat @ (ref @ w) + b
    ref = jnp.abs(ref)

    assert out.shape == (N, INPUT_DIMS)
    assert bool(jnp.all(out >= 0.0))                        # LeakyReLU(-1.0) == abs
    assert bool(jnp.allclose(out, ref, atol=1e-4, rtol=1e-4))

    # bf16 matmul-operand path (f32 accumulation on the MXU): looser tolerance
    # because A/H/W are rounded to bf16 across 6 compounding layers.
    out_bf16 = graphnet_forward(a_p, h_p, w_stack, b_stack, n=N,
                                input_dims=INPUT_DIMS, compute_dtype="bfloat16")
    jax.block_until_ready(out_bf16)
    assert out_bf16.shape == (N, INPUT_DIMS)
    assert bool(jnp.allclose(out_bf16, ref, atol=5e-2, rtol=5e-2))

    print("KERNEL_OK")
</pallas_src>

<mosaic_0001>
module attributes {stable_mosaic.version = 11 : i64} {
  func.func @kernel(%arg0: i32, %arg1: memref<128x128xf32, #tpu.memory_space<vmem>>, %arg2: memref<128x128xf32, #tpu.memory_space<vmem>>, %arg3: memref<6x128x128xf32, #tpu.memory_space<vmem>>, %arg4: memref<6x1x128xf32, #tpu.memory_space<vmem>>, %arg5: memref<128x128xf32, #tpu.memory_space<vmem>>) attributes {dimension_semantics = [#tpu.dimension_semantics<arbitrary>], iteration_bounds = array<i64: 1>, scalar_prefetch = 0 : i64, scratch_operands = 0 : i64, tpu.core_type = #tpu.core_type<tc>, window_params = [{pipeline_mode = #tpu.pipeline_mode<synchronous>, transform_indices = @transform_0, window_bounds = array<i64: 128, 128>}, {pipeline_mode = #tpu.pipeline_mode<synchronous>, transform_indices = @transform_1, window_bounds = array<i64: 128, 128>}, {pipeline_mode = #tpu.pipeline_mode<synchronous>, transform_indices = @transform_2, window_bounds = array<i64: 6, 128, 128>}, {pipeline_mode = #tpu.pipeline_mode<synchronous>, transform_indices = @transform_3, window_bounds = array<i64: 6, 1, 128>}, {pipeline_mode = #tpu.pipeline_mode<synchronous>, transform_indices = @transform_4, window_bounds = array<i64: 128, 128>}]} {
    %c0 = arith.constant 0 : index
    %c0_0 = arith.constant 0 : index
    %0 = vector.load %arg1[%c0, %c0_0] : memref<128x128xf32, #tpu.memory_space<vmem>>, vector<128x128xf32>
    %c0_1 = arith.constant 0 : index
    %c0_2 = arith.constant 0 : index
    %1 = vector.load %arg2[%c0_1, %c0_2] : memref<128x128xf32, #tpu.memory_space<vmem>>, vector<128x128xf32>
    %c0_3 = arith.constant 0 : index
    %c0_4 = arith.constant 0 : index
    %c0_5 = arith.constant 0 : index
    %2 = vector.load %arg3[%c0_3, %c0_4, %c0_5] : memref<6x128x128xf32, #tpu.memory_space<vmem>>, vector<1x128x128xf32>
    %3 = vector.shape_cast %2 : vector<1x128x128xf32> to vector<128x128xf32>
    %cst = arith.constant dense<0.000000e+00> : vector<128x128xf32>
    %4 = tpu.matmul %1, %3, %cst {dimension_numbers = #tpu.dot_dimension_numbers<[1], [0], [0], [1], [0, 0, 1, 1], [], []>} : vector<128x128xf32>, vector<128x128xf32>, vector<128x128xf32> -> vector<128x128xf32>
    %cst_6 = arith.constant dense<0.000000e+00> : vector<128x128xf32>
    %5 = tpu.matmul %0, %4, %cst_6 {dimension_numbers = #tpu.dot_dimension_numbers<[1], [0], [0], [1], [0, 0, 1, 1], [], []>} : vector<128x128xf32>, vector<128x128xf32>, vector<128x128xf32> -> vector<128x128xf32>
    %c0_7 = arith.constant 0 : index
    %c0_8 = arith.constant 0 : index
    %c0_9 = arith.constant 0 : index
    %6 = vector.load %arg4[%c0_7, %c0_8, %c0_9] : memref<6x1x128xf32, #tpu.memory_space<vmem>>, vector<1x1x128xf32>
    %7 = vector.shape_cast %6 : vector<1x1x128xf32> to vector<1x128xf32>
    %8 = vector.broadcast %7 : vector<1x128xf32> to vector<128x128xf32>
    %9 = arith.addf %5, %8 : vector<128x128xf32>
    %c1 = arith.constant 1 : index
    %c0_10 = arith.constant 0 : index
    %c0_11 = arith.constant 0 : index
    %10 = vector.load %arg3[%c1, %c0_10, %c0_11] : memref<6x128x128xf32, #tpu.memory_space<vmem>>, vector<1x128x128xf32>
    %11 = vector.shape_cast %10 : vector<1x128x128xf32> to vector<128x128xf32>
    %cst_12 = arith.constant dense<0.000000e+00> : vector<128x128xf32>
    %12 = tpu.matmul %9, %11, %cst_12 {dimension_numbers = #tpu.dot_dimension_numbers<[1], [0], [0], [1], [0, 0, 1, 1], [], []>} : vector<128x128xf32>, vector<128x128xf32>, vector<128x128xf32> -> vector<128x128xf32>
    %cst_13 = arith.constant dense<0.000000e+00> : vector<128x128xf32>
    %13 = tpu.matmul %0, %12, %cst_13 {dimension_numbers = #tpu.dot_dimension_numbers<[1], [0], [0], [1], [0, 0, 1, 1], [], []>} : vector<128x128xf32>, vector<128x128xf32>, vector<128x128xf32> -> vector<128x128xf32>
    %c1_14 = arith.constant 1 : index
    %c0_15 = arith.constant 0 : index
    %c0_16 = arith.constant 0 : index
    %14 = vector.load %arg4[%c1_14, %c0_15, %c0_16] : memref<6x1x128xf32, #tpu.memory_space<vmem>>, vector<1x1x128xf32>
    %15 = vector.shape_cast %14 : vector<1x1x128xf32> to vector<1x128xf32>
    %16 = vector.broadcast %15 : vector<1x128xf32> to vector<128x128xf32>
    %17 = arith.addf %13, %16 : vector<128x128xf32>
    %c2 = arith.constant 2 : index
    %c0_17 = arith.constant 0 : index
    %c0_18 = arith.constant 0 : index
    %18 = vector.load %arg3[%c2, %c0_17, %c0_18] : memref<6x128x128xf32, #tpu.memory_space<vmem>>, vector<1x128x128xf32>
    %19 = vector.shape_cast %18 : vector<1x128x128xf32> to vector<128x128xf32>
    %cst_19 = arith.constant dense<0.000000e+00> : vector<128x128xf32>
    %20 = tpu.matmul %17, %19, %cst_19 {dimension_numbers = #tpu.dot_dimension_numbers<[1], [0], [0], [1], [0, 0, 1, 1], [], []>} : vector<128x128xf32>, vector<128x128xf32>, vector<128x128xf32> -> vector<128x128xf32>
    %cst_20 = arith.constant dense<0.000000e+00> : vector<128x128xf32>
    %21 = tpu.matmul %0, %20, %cst_20 {dimension_numbers = #tpu.dot_dimension_numbers<[1], [0], [0], [1], [0, 0, 1, 1], [], []>} : vector<128x128xf32>, vector<128x128xf32>, vector<128x128xf32> -> vector<128x128xf32>
    %c2_21 = arith.constant 2 : index
    %c0_22 = arith.constant 0 : index
    %c0_23 = arith.constant 0 : index
    %22 = vector.load %arg4[%c2_21, %c0_22, %c0_23] : memref<6x1x128xf32, #tpu.memory_space<vmem>>, vector<1x1x128xf32>
    %23 = vector.shape_cast %22 : vector<1x1x128xf32> to vector<1x128xf32>
    %24 = vector.broadcast %23 : vector<1x128xf32> to vector<128x128xf32>
    %25 = arith.addf %21, %24 : vector<128x128xf32>
    %c3 = arith.constant 3 : index
    %c0_24 = arith.constant 0 : index
    %c0_25 = arith.constant 0 : index
    %26 = vector.load %arg3[%c3, %c0_24, %c0_25] : memref<6x128x128xf32, #tpu.memory_space<vmem>>, vector<1x128x128xf32>
    %27 = vector.shape_cast %26 : vector<1x128x128xf32> to vector<128x128xf32>
    %cst_26 = arith.constant dense<0.000000e+00> : vector<128x128xf32>
    %28 = tpu.matmul %25, %27, %cst_26 {dimension_numbers = #tpu.dot_dimension_numbers<[1], [0], [0], [1], [0, 0, 1, 1], [], []>} : vector<128x128xf32>, vector<128x128xf32>, vector<128x128xf32> -> vector<128x128xf32>
    %cst_27 = arith.constant dense<0.000000e+00> : vector<128x128xf32>
    %29 = tpu.matmul %0, %28, %cst_27 {dimension_numbers = #tpu.dot_dimension_numbers<[1], [0], [0], [1], [0, 0, 1, 1], [], []>} : vector<128x128xf32>, vector<128x128xf32>, vector<128x128xf32> -> vector<128x128xf32>
    %c3_28 = arith.constant 3 : index
    %c0_29 = arith.constant 0 : index
    %c0_30 = arith.constant 0 : index
    %30 = vector.load %arg4[%c3_28, %c0_29, %c0_30] : memref<6x1x128xf32, #tpu.memory_space<vmem>>, vector<1x1x128xf32>
    %31 = vector.shape_cast %30 : vector<1x1x128xf32> to vector<1x128xf32>
    %32 = vector.broadcast %31 : vector<1x128xf32> to vector<128x128xf32>
    %33 = arith.addf %29, %32 : vector<128x128xf32>
    %c4 = arith.constant 4 : index
    %c0_31 = arith.constant 0 : index
    %c0_32 = arith.constant 0 : index
    %34 = vector.load %arg3[%c4, %c0_31, %c0_32] : memref<6x128x128xf32, #tpu.memory_space<vmem>>, vector<1x128x128xf32>
    %35 = vector.shape_cast %34 : vector<1x128x128xf32> to vector<128x128xf32>
    %cst_33 = arith.constant dense<0.000000e+00> : vector<128x128xf32>
    %36 = tpu.matmul %33, %35, %cst_33 {dimension_numbers = #tpu.dot_dimension_numbers<[1], [0], [0], [1], [0, 0, 1, 1], [], []>} : vector<128x128xf32>, vector<128x128xf32>, vector<128x128xf32> -> vector<128x128xf32>
    %cst_34 = arith.constant dense<0.000000e+00> : vector<128x128xf32>
    %37 = tpu.matmul %0, %36, %cst_34 {dimension_numbers = #tpu.dot_dimension_numbers<[1], [0], [0], [1], [0, 0, 1, 1], [], []>} : vector<128x128xf32>, vector<128x128xf32>, vector<128x128xf32> -> vector<128x128xf32>
    %c4_35 = arith.constant 4 : index
    %c0_36 = arith.constant 0 : index
    %c0_37 = arith.constant 0 : index
    %38 = vector.load %arg4[%c4_35, %c0_36, %c0_37] : memref<6x1x128xf32, #tpu.memory_space<vmem>>, vector<1x1x128xf32>
    %39 = vector.shape_cast %38 : vector<1x1x128xf32> to vector<1x128xf32>
    %40 = vector.broadcast %39 : vector<1x128xf32> to vector<128x128xf32>
    %41 = arith.addf %37, %40 : vector<128x128xf32>
    %c5 = arith.constant 5 : index
    %c0_38 = arith.constant 0 : index
    %c0_39 = arith.constant 0 : index
    %42 = vector.load %arg3[%c5, %c0_38, %c0_39] : memref<6x128x128xf32, #tpu.memory_space<vmem>>, vector<1x128x128xf32>
    %43 = vector.shape_cast %42 : vector<1x128x128xf32> to vector<128x128xf32>
    %cst_40 = arith.constant dense<0.000000e+00> : vector<128x128xf32>
    %44 = tpu.matmul %41, %43, %cst_40 {dimension_numbers = #tpu.dot_dimension_numbers<[1], [0], [0], [1], [0, 0, 1, 1], [], []>} : vector<128x128xf32>, vector<128x128xf32>, vector<128x128xf32> -> vector<128x128xf32>
    %cst_41 = arith.constant dense<0.000000e+00> : vector<128x128xf32>
    %45 = tpu.matmul %0, %44, %cst_41 {dimension_numbers = #tpu.dot_dimension_numbers<[1], [0], [0], [1], [0, 0, 1, 1], [], []>} : vector<128x128xf32>, vector<128x128xf32>, vector<128x128xf32> -> vector<128x128xf32>
    %c5_42 = arith.constant 5 : index
    %c0_43 = arith.constant 0 : index
    %c0_44 = arith.constant 0 : index
    %46 = vector.load %arg4[%c5_42, %c0_43, %c0_44] : memref<6x1x128xf32, #tpu.memory_space<vmem>>, vector<1x1x128xf32>
    %47 = vector.shape_cast %46 : vector<1x1x128xf32> to vector<1x128xf32>
    %48 = vector.broadcast %47 : vector<1x128xf32> to vector<128x128xf32>
    %49 = arith.addf %45, %48 : vector<128x128xf32>
    %50 = math.absf %49 : vector<128x128xf32>
    %c0_45 = arith.constant 0 : index
    %c0_46 = arith.constant 0 : index
    %51 = vector.load %arg5[%c0_45, %c0_46] : memref<128x128xf32, #tpu.memory_space<vmem>>, vector<128x128xf32>
    tpu.vector_store %arg5[%c0_45, %c0_46], %50 {strides = array<i32>} : memref<128x128xf32, #tpu.memory_space<vmem>>, vector<128x128xf32>,
    return
  }
  func.func @transform_0(%arg0: i32) -> (i32, i32) {
    %c0_i32 = arith.constant 0 : i32
    %c0_i32_0 = arith.constant 0 : i32
    %c0_i32_1 = arith.constant 0 : i32
    return %c0_i32, %c0_i32_0 : i32, i32
  }
  func.func @transform_1(%arg0: i32) -> (i32, i32) {
    %c0_i32 = arith.constant 0 : i32
    %c0_i32_0 = arith.constant 0 : i32
    %c0_i32_1 = arith.constant 0 : i32
    return %c0_i32, %c0_i32_0 : i32, i32
  }
  func.func @transform_2(%arg0: i32) -> (i32, i32, i32) {
    %c0_i32 = arith.constant 0 : i32
    %c0_i32_0 = arith.constant 0 : i32
    %c0_i32_1 = arith.constant 0 : i32
    %c0_i32_2 = arith.constant 0 : i32
    return %c0_i32, %c0_i32_0, %c0_i32_1 : i32, i32, i32
  }
  func.func @transform_3(%arg0: i32) -> (i32, i32, i32) {
    %c0_i32 = arith.constant 0 : i32
    %c0_i32_0 = arith.constant 0 : i32
    %c0_i32_1 = arith.constant 0 : i32
    %c0_i32_2 = arith.constant 0 : i32
    return %c0_i32, %c0_i32_0, %c0_i32_1 : i32, i32, i32
  }
  func.func @transform_4(%arg0: i32) -> (i32, i32) {
    %c0_i32 = arith.constant 0 : i32
    %c0_i32_0 = arith.constant 0 : i32
    %c0_i32_1 = arith.constant 0 : i32
    return %c0_i32, %c0_i32_0 : i32, i32
  }
}

</mosaic_0001>

<bundles_post_ra>
// kernel: graphnet_forward.1
= control target key start
LH: loop header
LB: loop body
LE: loop exit
PB: predicated region body
PF: predicated region fallthrough
CT: control target
= control target key end

     0   :  { %9 = vsyncpa [#allocation3], 0  ;;  %s3456_s0 = inlined_call_operand.hbm [shape: f32[128,128], index: 0, kind: input, shape index: {}]   ;;  %s3457_s1 = inlined_call_operand.hbm [shape: f32[128,128], index: 1, kind: input, shape index: {}]   ;;  %s3458_s2 = inlined_call_operand.hbm [shape: f32[6,128,128], index: 2, kind: input, shape index: {}]   ;;  %s3459_s3 = inlined_call_operand.hbm [shape: f32[6,1,128], index: 3, kind: input, shape index: {}]   ;;  %s3460_s4 = inlined_call_operand.vmem [shape: f32[128,128], index: 4, kind: output, shape index: {}]  }
   0x1   :  { %10 = vsyncpa [#allocation5], 0 }
   0x2   :  { %11 = vsyncpa [#allocation8], 0  ;;  %s3203_s15 = smov [#allocation4]   ;;  %s3204_s17 = smov [#allocation2]  }
   0x3   :  { %s29_s16 = sshll.u32 %s3203_s15, 4  ;;  %s17_s18 = sshll.u32 %s3204_s17, 4  ;;  %s30_s16 = int_to_ptr.vmem [resolvable:$true] %s29_s16  ;;  %s18_s18 = int_to_ptr.vmem [resolvable:$true] %s17_s18 }
   0x4   :  { %s3125_s19 = scalar_lea.vmem %s30_s16, 2048  ;;  %p3130_p1 = scmp.lt.s32.totalorder %s30_s16, %s30_s16 }
   0x5   :  { %p3126_p0 = scmp.ne.s32.totalorder %s30_s16, %s3125_s19  ;;  %p3131_p2 = scmp.lt.s32.totalorder %s3125_s19, %s3125_s19 }
   0x7   :  { %p3132_p3 = por %p3131_p2, %p3130_p1 }
   0x9   :  { %p3133_p4 = pnand %p3132_p3, %p3126_p0 }
   0xb   :  { %3136 = shalt.err (!%p3133_p4)
}
   0xc   :  { %s3205_s20 = smov 128   ;;  %s3206_s21 = smov 8  }
   0xd   :  { %35 = dma.hbm_to_vmem [thread:$0]  %s3457_s1, 2048, %s30_s16, [#allocation5], %s3205_s20, %s3205_s20, %s3206_s21  }
   0xe   :  { %s3145_s24 = scalar_lea.vmem %s18_s18, 2048  ;;  %p3150_p6 = scmp.lt.s32.totalorder %s18_s18, %s18_s18 }
   0xf   :  { %p3146_p5 = scmp.ne.s32.totalorder %s18_s18, %s3145_s24  ;;  %p3151_p7 = scmp.lt.s32.totalorder %s3145_s24, %s3145_s24 }
  0x11   :  { %p3152_p8 = por %p3151_p7, %p3150_p6 }
  0x13   :  { %p3153_p9 = pnand %p3152_p8, %p3146_p5 }
  0x15   :  { %3156 = shalt.err (!%p3153_p9)
}
  0x16   :  { %23 = dma.hbm_to_vmem [thread:$0]  %s3456_s0, 2048, %s18_s18, [#allocation3], %s3205_s20, %s3205_s20, %s3206_s21  }
  0x17   :  { %s3207_s27 = smov [#allocation6]   ;;  %s3208_s29 = smov [#allocation7]  }
  0x18   :  { %s41_s28 = sshll.u32 %s3207_s27, 4  ;;  %s53_s30 = sshll.u32 %s3208_s29, 4  ;;  %s42_s28 = int_to_ptr.vmem [resolvable:$true] %s41_s28  ;;  %s54_s30 = int_to_ptr.vmem [resolvable:$true] %s53_s30 }
  0x19   :  { %s3165_s5 = scalar_lea.vmem %s42_s28, 12288  ;;  %p3170_p11 = scmp.lt.s32.totalorder %s42_s28, %s42_s28 }
  0x1a   :  { %p3166_p10 = scmp.ne.s32.totalorder %s42_s28, %s3165_s5  ;;  %p3171_p12 = scmp.lt.s32.totalorder %s3165_s5, %s3165_s5 }
  0x1c   :  { %p3172_p13 = por %p3171_p12, %p3170_p11 }
  0x1e   :  { %p3173_p0 = pnand %p3172_p13, %p3166_p10 }
  0x20   :  { %3176 = shalt.err (!%p3173_p0)
}
  0x21   :  { %47 = dma.hbm_to_vmem [thread:$0]  %s3458_s2, 12288, %s42_s28, [#allocation5], %s3205_s20, %s3205_s20, %s3206_s21  }
  0x22   :  { %s3185_s7 = scalar_lea.vmem %s54_s30, 96  ;;  %p3190_p2 = scmp.lt.s32.totalorder %s54_s30, %s54_s30 }
  0x23   :  { %p3186_p1 = scmp.ne.s32.totalorder %s54_s30, %s3185_s7  ;;  %p3191_p3 = scmp.lt.s32.totalorder %s3185_s7, %s3185_s7 }
  0x25   :  { %p3192_p4 = por %p3191_p3, %p3190_p2 }
  0x27   :  { %p3193_p5 = pnand %p3192_p4, %p3186_p1 }
  0x29   :  { %3196 = shalt.err (!%p3193_p5)
}
  0x2a   :  { %s3209_s0 = smov 16   ;;  %s3210_s8 = smov 1  }
  0x2b   :  { %59 = dma.hbm_to_vmem [thread:$0]  %s3459_s3, 96, %s54_s30, [#allocation8], %s3209_s0, %s3209_s0, %s3210_s8  }
  0x2c   :  { %3197 = dma.done.wait [#allocation3], 2048  }
  0x2d   :  { %3198 = vsyncadd [#allocation3], 4294965248 }
  0x2e   :  { %3199 = dma.done.wait [#allocation5], 14336  }
  0x2f   :  { %3200 = vsyncadd [#allocation5], 4294952960 }
  0x30   :  { %3201 = dma.done.wait [#allocation8], 96  }
  0x31   :  { %3202 = vsyncadd [#allocation8], 4294967200  ;;  %v119_v0 = vld [vmem:[#allocation6 + $0x78] sm:$0xff]  ;;  %v118_v1 = vld [vmem:[#allocation6 + $0x70] sm:$0xff] }
  0x32   :  { %2421 = vmatprep.subr.mxu0 %v119_v0  ;;  %v117_v2 = vld [vmem:[#allocation6 + $0x68] sm:$0xff]  ;;  %v116_v3 = vld [vmem:[#allocation6 + $0x60] sm:$0xff]  ;;  %v115_v5 = vld [vmem:[#allocation6 + $0x58] sm:$0xff] }
  0x33   :  { %2422 = vmatpush3.msra.mxu0 %v119_v0  ;;  %v88_v4 = vld [vmem:[#allocation4] sm:$0xff]  ;;  %v114_v6 = vld [vmem:[#allocation6 + $0x50] sm:$0xff]  ;;  %v113_v7 = vld [vmem:[#allocation6 + $0x48] sm:$0xff] }
  0x34   :  { %2423 = vmatprep.subr.mxu0 %v118_v1  ;;  %2453 = vmatprep.mubr.f32.mxu0 %v88_v4  ;;  %v112_v8 = vld [vmem:[#allocation6 + $0x40] sm:$0xff]  ;;  %v111_v9 = vld [vmem:[#allocation6 + $0x38] sm:$0xff]  ;;  %v110_v10 = vld [vmem:[#allocation6 + $0x30] sm:$0xff] }
  0x35   :  { %2424 = vmatpush3.msra.mxu0 %v118_v1  ;;  %v109_v11 = vld [vmem:[#allocation6 + $0x28] sm:$0xff]  ;;  %v108_v12 = vld [vmem:[#allocation6 + $0x20] sm:$0xff]  ;;  %v107_v13 = vld [vmem:[#allocation6 + $0x18] sm:$0xff] }
  0x36   :  { %2425 = vmatprep.subr.mxu0 %v117_v2  ;;  %v106_v14 = vld [vmem:[#allocation6 + $0x10] sm:$0xff]  ;;  %v105_v15 = vld [vmem:[#allocation6 + $0x8] sm:$0xff]  ;;  %v104_v16 = vld [vmem:[#allocation6] sm:$0xff] }
  0x37   :  { %2426 = vmatpush3.msra.mxu0 %v117_v2  ;;  %v89_v17 = vld [vmem:[#allocation4 + $0x8] sm:$0xff]  ;;  %v90_v18 = vld [vmem:[#allocation4 + $0x10] sm:$0xff]  ;;  %v91_v19 = vld [vmem:[#allocation4 + $0x18] sm:$0xff] }
  0x38   :  { %2427 = vmatprep.subr.mxu0 %v116_v3  ;;  %v92_v20 = vld [vmem:[#allocation4 + $0x20] sm:$0xff]  ;;  %v93_v21 = vld [vmem:[#allocation4 + $0x28] sm:$0xff]  ;;  %v94_v22 = vld [vmem:[#allocation4 + $0x30] sm:$0xff] }
  0x39   :  { %2428 = vmatpush3.msra.mxu0 %v116_v3  ;;  %v95_v23 = vld [vmem:[#allocation4 + $0x38] sm:$0xff]  ;;  %v96_v24 = vld [vmem:[#allocation4 + $0x40] sm:$0xff]  ;;  %v97_v25 = vld [vmem:[#allocation4 + $0x48] sm:$0xff] }
  0x3a   :  { %2429 = vmatprep.subr.mxu0 %v115_v5  ;;  %v98_v26 = vld [vmem:[#allocation4 + $0x50] sm:$0xff]  ;;  %v99_v27 = vld [vmem:[#allocation4 + $0x58] sm:$0xff]  ;;  %v100_v28 = vld [vmem:[#allocation4 + $0x60] sm:$0xff] }
  0x3b   :  { %2430 = vmatpush3.msra.mxu0 %v115_v5  ;;  %v101_v29 = vld [vmem:[#allocation4 + $0x68] sm:$0xff]  ;;  %v102_v30 = vld [vmem:[#allocation4 + $0x70] sm:$0xff]  ;;  %v103_v31 = vld [vmem:[#allocation4 + $0x78] sm:$0xff] }
  0x3c   :  { %2431 = vmatprep.subr.mxu0 %v114_v6  ;;  %v3248_v32 = vld [vmem:[#allocation2] sm:$0xff]  ;;  %v433_v33 = vld [vmem:[#allocation6 + $0xf8] sm:$0xff]  ;;  %v432_v34 = vld [vmem:[#allocation6 + $0xf0] sm:$0xff] }
  0x3d   :  { %2432 = vmatpush3.msra.mxu0 %v114_v6  ;;  %2509 = vmatprep.mubr.f32.mxu1 %v3248_v32  ;;  %v431_v35 = vld [vmem:[#allocation6 + $0xe8] sm:$0xff]  ;;  %v430_v36 = vld [vmem:[#allocation6 + $0xe0] sm:$0xff]  ;;  %v429_v37 = vld [vmem:[#allocation6 + $0xd8] sm:$0xff] }
  0x3e   :  { %2433 = vmatprep.subr.mxu0 %v113_v7  ;;  %v428_v38 = vld [vmem:[#allocation6 + $0xd0] sm:$0xff]  ;;  %v427_v39 = vld [vmem:[#allocation6 + $0xc8] sm:$0xff]  ;;  %v426_v40 = vld [vmem:[#allocation6 + $0xc0] sm:$0xff] }
  0x3f   :  { %2434 = vmatpush3.msra.mxu0 %v113_v7  ;;  %v425_v41 = vld [vmem:[#allocation6 + $0xb8] sm:$0xff]  ;;  %v424_v42 = vld [vmem:[#allocation6 + $0xb0] sm:$0xff]  ;;  %v423_v43 = vld [vmem:[#allocation6 + $0xa8] sm:$0xff] }
  0x40   :  { %2435 = vmatprep.subr.mxu0 %v112_v8  ;;  %v422_v44 = vld [vmem:[#allocation6 + $0xa0] sm:$0xff]  ;;  %v421_v45 = vld [vmem:[#allocation6 + $0x98] sm:$0xff]  ;;  %v3251_v62 = vld [vmem:[#allocation2 + $0x8] sm:$0xff] }
  0x41   :  { %2436 = vmatpush3.msra.mxu0 %v112_v8  ;;  %v3253_v63 = vld [vmem:[#allocation2 + $0x10] sm:$0xff]  ;;  %v3257_v0 = vld [vmem:[#allocation2 + $0x18] sm:$0xff]  ;;  %v3259_v1 = vld [vmem:[#allocation2 + $0x20] sm:$0xff] }
  0x42   :  { %2437 = vmatprep.subr.mxu0 %v111_v9  ;;  %v3263_v2 = vld [vmem:[#allocation2 + $0x28] sm:$0xff]  ;;  %v3265_v3 = vld [vmem:[#allocation2 + $0x30] sm:$0xff]  ;;  %v3269_v4 = vld [vmem:[#allocation2 + $0x38] sm:$0xff] }
  0x43   :  { %2438 = vmatpush3.msra.mxu0 %v111_v9  ;;  %v3271_v5 = vld [vmem:[#allocation2 + $0x40] sm:$0xff]  ;;  %v3275_v6 = vld [vmem:[#allocation2 + $0x48] sm:$0xff]  ;;  %v3277_v7 = vld [vmem:[#allocation2 + $0x50] sm:$0xff] }
  0x44   :  { %2439 = vmatprep.subr.mxu0 %v110_v10  ;;  %v3281_v8 = vld [vmem:[#allocation2 + $0x58] sm:$0xff]  ;;  %v3283_v9 = vld [vmem:[#allocation2 + $0x60] sm:$0xff] }
  0x45   :  { %2440 = vmatpush3.msra.mxu0 %v110_v10  ;;  %v3287_v10 = vld [vmem:[#allocation2 + $0x68] sm:$0xff] }
  0x46   :  { %2441 = vmatprep.subr.mxu0 %v109_v11 }
  0x47   :  { %2442 = vmatpush3.msra.mxu0 %v109_v11  ;;  %v3289_v11 = vld [vmem:[#allocation2 + $0x70] sm:$0xff] }
  0x48   :  { %2443 = vmatprep.subr.mxu0 %v108_v12 }
  0x49   :  { %2444 = vmatpush3.msra.mxu0 %v108_v12  ;;  %v3293_v12 = vld [vmem:[#allocation2 + $0x78] sm:$0xff] }
  0x4a   :  { %2445 = vmatprep.subr.mxu0 %v107_v13 }
  0x4b   :  { %2446 = vmatpush3.msra.mxu0 %v107_v13  ;;  %v420_v13 = vld [vmem:[#allocation6 + $0x90] sm:$0xff] }
  0x4c   :  { %2447 = vmatprep.subr.mxu0 %v106_v14 }
  0x4d   :  { %2448 = vmatpush3.msra.mxu0 %v106_v14  ;;  %v419_v14 = vld [vmem:[#allocation6 + $0x88] sm:$0xff] }
  0x4e   :  { %2449 = vmatprep.subr.mxu0 %v105_v15 }
  0x4f   :  { %2450 = vmatpush3.msra.mxu0 %v105_v15  ;;  %v418_v15 = vld [vmem:[#allocation6 + $0x80] sm:$0xff] }
  0x50   :  { %2451 = vmatprep.subr.mxu0 %v104_v16 }
  0x51   :  { %2452 = vmatpush3.msra.mxu0 %v104_v16 }
  0x52   :  { %2454 = vmatmul.mubr.f32.vlgmr.msra.gmra.mxu0 %v89_v17  ;;  %2533 = vmatprep.subr.mxu0 %v433_v33  ;;  %v2031_v17 = vld [vmem:[#allocation7] ss:$0 sm:$0xff] }
  0x53   :  { %2456 = vmatprep.mubr.f32.mxu0 %v90_v18  ;;  %2534 = vmatpush3.msra.mxu0 %v433_v33 }
  0x54   :  { %2535 = vmatprep.subr.mxu0 %v432_v34 }
  0x55   :  { %2536 = vmatpush3.msra.mxu0 %v432_v34 }
  0x56   :  { %2457 = vmatmul.mubr.f32.gmra.mxu0 %v91_v19  ;;  %2537 = vmatprep.subr.mxu0 %v431_v35 }
  0x57   :  { %2459 = vmatprep.mubr.f32.mxu0 %v92_v20  ;;  %2538 = vmatpush3.msra.mxu0 %v431_v35 }
  0x58   :  { %2539 = vmatprep.subr.mxu0 %v430_v36 }
  0x59   :  { %2540 = vmatpush3.msra.mxu0 %v430_v36 }
  0x5a   :  { %2460 = vmatmul.mubr.f32.gmra.mxu0 %v93_v21  ;;  %2541 = vmatprep.subr.mxu0 %v429_v37 }
  0x5b   :  { %2462 = vmatprep.mubr.f32.mxu0 %v94_v22  ;;  %2542 = vmatpush3.msra.mxu0 %v429_v37 }
  0x5c   :  { %2543 = vmatprep.subr.mxu0 %v428_v38 }
  0x5d   :  { %2544 = vmatpush3.msra.mxu0 %v428_v38 }
  0x5e   :  { %2463 = vmatmul.mubr.f32.gmra.mxu0 %v95_v23  ;;  %2545 = vmatprep.subr.mxu0 %v427_v39 }
  0x5f   :  { %2465 = vmatprep.mubr.f32.mxu0 %v96_v24  ;;  %2546 = vmatpush3.msra.mxu0 %v427_v39 }
  0x60   :  { %2547 = vmatprep.subr.mxu0 %v426_v40 }
  0x61   :  { %2548 = vmatpush3.msra.mxu0 %v426_v40 }
  0x62   :  { %2466 = vmatmul.mubr.f32.gmra.mxu0 %v97_v25  ;;  %2549 = vmatprep.subr.mxu0 %v425_v41 }
  0x63   :  { %2468 = vmatprep.mubr.f32.mxu0 %v98_v26  ;;  %2550 = vmatpush3.msra.mxu0 %v425_v41 }
  0x64   :  { %2551 = vmatprep.subr.mxu0 %v424_v42 }
  0x65   :  { %2552 = vmatpush3.msra.mxu0 %v424_v42 }
  0x66   :  { %2469 = vmatmul.mubr.f32.gmra.mxu0 %v99_v27  ;;  %2553 = vmatprep.subr.mxu0 %v423_v43 }
  0x67   :  { %2471 = vmatprep.mubr.f32.mxu0 %v100_v28  ;;  %2554 = vmatpush3.msra.mxu0 %v423_v43 }
  0x68   :  { %2555 = vmatprep.subr.mxu0 %v422_v44 }
  0x69   :  { %2556 = vmatpush3.msra.mxu0 %v422_v44 }
  0x6a   :  { %2472 = vmatmul.mubr.f32.gmra.mxu0 %v101_v29  ;;  %2557 = vmatprep.subr.mxu0 %v421_v45 }
  0x6b   :  { %2474 = vmatprep.mubr.f32.mxu0 %v102_v30  ;;  %2558 = vmatpush3.msra.mxu0 %v421_v45 }
  0x6c   :  { %2559 = vmatprep.subr.mxu0 %v420_v13 }
  0x6d   :  { %2560 = vmatpush3.msra.mxu0 %v420_v13  ;;  %v736_v13 = vld [vmem:[#allocation6 + $0x118] sm:$0xff] }
  0x6e   :  { %2475 = vmatmul.mubr.f32.gmra.mxu0 %v103_v31  ;;  %2561 = vmatprep.subr.mxu0 %v419_v14 }
  0x6f   :  { %2562 = vmatpush3.msra.mxu0 %v419_v14 }
  0x70   :  { %2563 = vmatprep.subr.mxu0 %v418_v15 }
  0x71   :  { %2564 = vmatpush3.msra.mxu0 %v418_v15 }
 0x112   :  { %v2455_v46 = vpop.f32.mrf.mxu0 }
 0x114   :  { %v186_v47 = vpop.f32.mrf.mxu0 }
 0x116   :  { %v2458_v48 = vpop.f32.mrf.mxu0 }
 0x118   :  { %v196_v49 = vpop.f32.mrf.mxu0 }
 0x11a   :  { %v2461_v50 = vpop.f32.mrf.mxu0 }
 0x11c   :  { %v206_v51 = vpop.f32.mrf.mxu0 }
 0x11e   :  { %v2464_v52 = vpop.f32.mrf.mxu0 }
 0x120   :  { %v216_v53 = vpop.f32.mrf.mxu0 }
 0x122   :  { %v2467_v54 = vpop.f32.mrf.mxu0 }
 0x124   :  { %v226_v55 = vpop.f32.mrf.mxu0 }
 0x126   :  { %v2470_v56 = vpop.f32.mrf.mxu0 }
 0x128   :  { %v236_v57 = vpop.f32.mrf.mxu0 }
 0x12a   :  { %v2473_v58 = vpop.f32.mrf.mxu0 }
 0x12c   :  { %v246_v59 = vpop.f32.mrf.mxu0 }
 0x12e   :  { %v2476_v60 = vpop.f32.mrf.mxu0 }
 0x12f   :  { %2477 = vmatprep.subr.mxu1 %v2476_v60 }
 0x130   :  { %v256_v61 = vpop.f32.mrf.mxu0  ;;  %2478 = vmatpush3.msra.mxu1 %v2476_v60  ;;  %v738_v60 = vld [vmem:[#allocation6 + $0x128] sm:$0xff] }
 0x131   :  { %2479 = vmatprep.subr.mxu1 %v256_v61 }
 0x132   :  { %2480 = vmatpush3.msra.mxu1 %v256_v61  ;;  %v737_v61 = vld [vmem:[#allocation6 + $0x120] sm:$0xff] }
 0x133   :  { %2481 = vmatprep.subr.mxu1 %v2473_v58 }
 0x134   :  { %2482 = vmatpush3.msra.mxu1 %v2473_v58  ;;  %v740_v58 = vld [vmem:[#allocation6 + $0x138] sm:$0xff] }
 0x135   :  { %2483 = vmatprep.subr.mxu1 %v246_v59 }
 0x136   :  { %2484 = vmatpush3.msra.mxu1 %v246_v59  ;;  %v739_v59 = vld [vmem:[#allocation6 + $0x130] sm:$0xff] }
 0x137   :  { %2485 = vmatprep.subr.mxu1 %v2470_v56 }
 0x138   :  { %2486 = vmatpush3.msra.mxu1 %v2470_v56  ;;  %v742_v56 = vld [vmem:[#allocation6 + $0x148] sm:$0xff] }
 0x139   :  { %2487 = vmatprep.subr.mxu1 %v236_v57 }
 0x13a   :  { %2488 = vmatpush3.msra.mxu1 %v236_v57  ;;  %v741_v57 = vld [vmem:[#allocation6 + $0x140] sm:$0xff] }
 0x13b   :  { %2489 = vmatprep.subr.mxu1 %v2467_v54 }
 0x13c   :  { %2490 = vmatpush3.msra.mxu1 %v2467_v54  ;;  %v744_v54 = vld [vmem:[#allocation6 + $0x158] sm:$0xff] }
 0x13d   :  { %2491 = vmatprep.subr.mxu1 %v226_v55 }
 0x13e   :  { %2492 = vmatpush3.msra.mxu1 %v226_v55  ;;  %v743_v55 = vld [vmem:[#allocation6 + $0x150] sm:$0xff] }
 0x13f   :  { %2493 = vmatprep.subr.mxu1 %v2464_v52 }
 0x140   :  { %2494 = vmatpush3.msra.mxu1 %v2464_v52  ;;  %v746_v52 = vld [vmem:[#allocation6 + $0x168] sm:$0xff] }
 0x141   :  { %2495 = vmatprep.subr.mxu1 %v216_v53 }
 0x142   :  { %2496 = vmatpush3.msra.mxu1 %v216_v53  ;;  %v745_v53 = vld [vmem:[#allocation6 + $0x160] sm:$0xff] }
 0x143   :  { %2497 = vmatprep.subr.mxu1 %v2461_v50 }
 0x144   :  { %2498 = vmatpush3.msra.mxu1 %v2461_v50  ;;  %v748_v50 = vld [vmem:[#allocation6 + $0x178] sm:$0xff] }
 0x145   :  { %2499 = vmatprep.subr.mxu1 %v206_v51  ;;  %2645 = vmatprep.subr.mxu0 %v748_v50 }
 0x146   :  { %2500 = vmatpush3.msra.mxu1 %v206_v51  ;;  %v747_v51 = vld [vmem:[#allocation6 + $0x170] sm:$0xff] }
 0x147   :  { %2501 = vmatprep.subr.mxu1 %v2458_v48 }
 0x148   :  { %2502 = vmatpush3.msra.mxu1 %v2458_v48 }
 0x149   :  { %2503 = vmatprep.subr.mxu1 %v196_v49 }
 0x14a   :  { %2504 = vmatpush3.msra.mxu1 %v196_v49 }
 0x14b   :  { %2505 = vmatprep.subr.mxu1 %v2455_v46 }
 0x14c   :  { %2506 = vmatpush3.msra.mxu1 %v2455_v46 }
 0x14d   :  { %2507 = vmatprep.subr.mxu1 %v186_v47 }
 0x14e   :  { %2508 = vmatpush3.msra.mxu1 %v186_v47 }
 0x14f   :  { %2510 = vmatmul.mubr.f32.vlgmr.msra.gmra.mxu1 %v3251_v62 }
 0x150   :  { %2512 = vmatprep.mubr.f32.mxu1 %v3253_v63 }
 0x153   :  { %2513 = vmatmul.mubr.f32.gmra.mxu1 %v3257_v0 }
 0x154   :  { %2515 = vmatprep.mubr.f32.mxu1 %v3259_v1 }
 0x157   :  { %2516 = vmatmul.mubr.f32.gmra.mxu1 %v3263_v2 }
 0x158   :  { %2518 = vmatprep.mubr.f32.mxu1 %v3265_v3 }
 0x15b   :  { %2519 = vmatmul.mubr.f32.gmra.mxu1 %v3269_v4 }
 0x15c   :  { %2521 = vmatprep.mubr.f32.mxu1 %v3271_v5 }
 0x15f   :  { %2522 = vmatmul.mubr.f32.gmra.mxu1 %v3275_v6 }
 0x160   :  { %2524 = vmatprep.mubr.f32.mxu1 %v3277_v7 }
 0x163   :  { %2525 = vmatmul.mubr.f32.gmra.mxu1 %v3281_v8 }
 0x164   :  { %2527 = vmatprep.mubr.f32.mxu1 %v3283_v9 }
 0x167   :  { %2528 = vmatmul.mubr.f32.gmra.mxu1 %v3287_v10 }
 0x168   :  { %2530 = vmatprep.mubr.f32.mxu1 %v3289_v11 }
 0x16b   :  { %2531 = vmatmul.mubr.f32.gmra.mxu1 %v3293_v12 }
 0x16c   :  { %2621 = vmatprep.mubr.f32.mxu1 %v3248_v32 }
 0x20f   :  { %v2511_v16 = vpop.f32.mrf.mxu1 }
 0x210   :  { %v344_v20 = vadd.f32 %v2511_v16, %v2031_v17 }
 0x211   :  { %v338_v18 = vpop.f32.mrf.mxu1 }
 0x212   :  { %v339_v19 = vadd.f32 %v2031_v17, %v338_v18 }
 0x213   :  { %v2514_v21 = vpop.f32.mrf.mxu1 }
 0x214   :  { %2565 = vmatprep.mubr.f32.mxu0 %v339_v19  ;;  %v354_v24 = vadd.f32 %v2514_v21, %v2031_v17 }
 0x215   :  { %v348_v22 = vpop.f32.mrf.mxu1  ;;  %2566 = vmatmul.mubr.f32.vlgmr.msra.gmra.mxu0 %v344_v20 }
 0x216   :  { %v349_v23 = vadd.f32 %v2031_v17, %v348_v22  ;;  %2646 = vmatpush3.msra.mxu0 %v748_v50 }
 0x217   :  { %v2517_v25 = vpop.f32.mrf.mxu1  ;;  %2647 = vmatprep.subr.mxu0 %v747_v51 }
 0x218   :  { %2568 = vmatprep.mubr.f32.mxu0 %v349_v23  ;;  %v364_v28 = vadd.f32 %v2517_v25, %v2031_v17  ;;  %2648 = vmatpush3.msra.mxu0 %v747_v51 }
 0x219   :  { %v358_v26 = vpop.f32.mrf.mxu1  ;;  %2569 = vmatmul.mubr.f32.gmra.mxu0 %v354_v24  ;;  %2649 = vmatprep.subr.mxu0 %v746_v52 }
 0x21a   :  { %v359_v27 = vadd.f32 %v2031_v17, %v358_v26  ;;  %2650 = vmatpush3.msra.mxu0 %v746_v52 }
 0x21b   :  { %v2520_v29 = vpop.f32.mrf.mxu1  ;;  %2651 = vmatprep.subr.mxu0 %v745_v53 }
 0x21c   :  { %2571 = vmatprep.mubr.f32.mxu0 %v359_v27  ;;  %v374_v33 = vadd.f32 %v2520_v29, %v2031_v17  ;;  %2652 = vmatpush3.msra.mxu0 %v745_v53 }
 0x21d   :  { %v368_v30 = vpop.f32.mrf.mxu1  ;;  %2572 = vmatmul.mubr.f32.gmra.mxu0 %v364_v28  ;;  %2653 = vmatprep.subr.mxu0 %v744_v54 }
 0x21e   :  { %v369_v31 = vadd.f32 %v2031_v17, %v368_v30  ;;  %2654 = vmatpush3.msra.mxu0 %v744_v54  ;;  %v735_v30 = vld [vmem:[#allocation6 + $0x110] sm:$0xff] }
 0x21f   :  { %v2523_v34 = vpop.f32.mrf.mxu1  ;;  %2655 = vmatprep.subr.mxu0 %v743_v55 }
 0x220   :  { %2574 = vmatprep.mubr.f32.mxu0 %v369_v31  ;;  %v384_v37 = vadd.f32 %v2523_v34, %v2031_v17  ;;  %2656 = vmatpush3.msra.mxu0 %v743_v55  ;;  %v734_v31 = vld [vmem:[#allocation6 + $0x108] sm:$0xff] }
 0x221   :  { %v378_v35 = vpop.f32.mrf.mxu1  ;;  %2575 = vmatmul.mubr.f32.gmra.mxu0 %v374_v33  ;;  %2657 = vmatprep.subr.mxu0 %v742_v56  ;;  %v733_v33 = vld [vmem:[#allocation6 + $0x100] sm:$0xff] }
 0x222   :  { %v379_v36 = vadd.f32 %v2031_v17, %v378_v35  ;;  %2658 = vmatpush3.msra.mxu0 %v742_v56  ;;  %v2032_v35 = vld [vmem:[#allocation7 + $0x1] ss:$0 sm:$0xff] }
 0x223   :  { %v2526_v38 = vpop.f32.mrf.mxu1  ;;  %2659 = vmatprep.subr.mxu0 %v741_v57 }
 0x224   :  { %2577 = vmatprep.mubr.f32.mxu0 %v379_v36  ;;  %v394_v41 = vadd.f32 %v2526_v38, %v2031_v17  ;;  %2660 = vmatpush3.msra.mxu0 %v741_v57 }
 0x225   :  { %v388_v39 = vpop.f32.mrf.mxu1  ;;  %2578 = vmatmul.mubr.f32.gmra.mxu0 %v384_v37  ;;  %2661 = vmatprep.subr.mxu0 %v740_v58 }
 0x226   :  { %v389_v40 = vadd.f32 %v2031_v17, %v388_v39  ;;  %2662 = vmatpush3.msra.mxu0 %v740_v58 }
 0x227   :  { %v2529_v42 = vpop.f32.mrf.mxu1  ;;  %2663 = vmatprep.subr.mxu0 %v739_v59 }
 0x228   :  { %2580 = vmatprep.mubr.f32.mxu0 %v389_v40  ;;  %v404_v45 = vadd.f32 %v2529_v42, %v2031_v17  ;;  %2664 = vmatpush3.msra.mxu0 %v739_v59 }
 0x229   :  { %v398_v43 = vpop.f32.mrf.mxu1  ;;  %2581 = vmatmul.mubr.f32.gmra.mxu0 %v394_v41  ;;  %2665 = vmatprep.subr.mxu0 %v738_v60 }
 0x22a   :  { %v399_v44 = vadd.f32 %v2031_v17, %v398_v43  ;;  %2666 = vmatpush3.msra.mxu0 %v738_v60 }
 0x22b   :  { %v2532_v46 = vpop.f32.mrf.mxu1  ;;  %2667 = vmatprep.subr.mxu0 %v737_v61 }
 0x22c   :  { %2583 = vmatprep.mubr.f32.mxu0 %v399_v44  ;;  %v414_v49 = vadd.f32 %v2532_v46, %v2031_v17  ;;  %2668 = vmatpush3.msra.mxu0 %v737_v61 }
 0x22d   :  { %v408_v47 = vpop.f32.mrf.mxu1  ;;  %2584 = vmatmul.mubr.f32.gmra.mxu0 %v404_v45  ;;  %2669 = vmatprep.subr.mxu0 %v736_v13 }
 0x22e   :  { %v409_v48 = vadd.f32 %v2031_v17, %v408_v47  ;;  %2670 = vmatpush3.msra.mxu0 %v736_v13 }
 0x22f   :  { %2671 = vmatprep.subr.mxu0 %v735_v30 }
 0x230   :  { %2586 = vmatprep.mubr.f32.mxu0 %v409_v48  ;;  %2672 = vmatpush3.msra.mxu0 %v735_v30  ;;  %v1051_v30 = vld [vmem:[#allocation6 + $0x198] sm:$0xff] }
 0x231   :  { %2587 = vmatmul.mubr.f32.gmra.mxu0 %v414_v49  ;;  %2673 = vmatprep.subr.mxu0 %v734_v31 }
 0x232   :  { %2674 = vmatpush3.msra.mxu0 %v734_v31 }
 0x233   :  { %2675 = vmatprep.subr.mxu0 %v733_v33 }
 0x234   :  { %2676 = vmatpush3.msra.mxu0 %v733_v33 }
 0x2d5   :  { %v2567_v14 = vpop.f32.mrf.mxu0 }
 0x2d7   :  { %v500_v15 = vpop.f32.mrf.mxu0 }
 0x2d9   :  { %v2570_v16 = vpop.f32.mrf.mxu0 }
 0x2db   :  { %v510_v17 = vpop.f32.mrf.mxu0 }
 0x2dd   :  { %v2573_v18 = vpop.f32.mrf.mxu0 }
 0x2df   :  { %v520_v19 = vpop.f32.mrf.mxu0 }
 0x2e1   :  { %v2576_v20 = vpop.f32.mrf.mxu0 }
 0x2e3   :  { %v530_v21 = vpop.f32.mrf.mxu0 }
 0x2e5   :  { %v2579_v22 = vpop.f32.mrf.mxu0 }
 0x2e7   :  { %v540_v23 = vpop.f32.mrf.mxu0 }
 0x2e9   :  { %v2582_v24 = vpop.f32.mrf.mxu0 }
 0x2eb   :  { %v550_v25 = vpop.f32.mrf.mxu0 }
 0x2ed   :  { %v2585_v26 = vpop.f32.mrf.mxu0 }
 0x2ef   :  { %v560_v27 = vpop.f32.mrf.mxu0 }
 0x2f1   :  { %v2588_v28 = vpop.f32.mrf.mxu0 }
 0x2f2   :  { %2589 = vmatprep.subr.mxu1 %v2588_v28 }
 0x2f3   :  { %v570_v29 = vpop.f32.mrf.mxu0  ;;  %2590 = vmatpush3.msra.mxu1 %v2588_v28  ;;  %v1053_v28 = vld [vmem:[#allocation6 + $0x1a8] sm:$0xff] }
 0x2f4   :  { %2591 = vmatprep.subr.mxu1 %v570_v29 }
 0x2f5   :  { %2592 = vmatpush3.msra.mxu1 %v570_v29  ;;  %v1052_v29 = vld [vmem:[#allocation6 + $0x1a0] sm:$0xff] }
 0x2f6   :  { %2593 = vmatprep.subr.mxu1 %v2585_v26 }
 0x2f7   :  { %2594 = vmatpush3.msra.mxu1 %v2585_v26  ;;  %v1055_v26 = vld [vmem:[#allocation6 + $0x1b8] sm:$0xff] }
 0x2f8   :  { %2595 = vmatprep.subr.mxu1 %v560_v27 }
 0x2f9   :  { %2596 = vmatpush3.msra.mxu1 %v560_v27  ;;  %v1054_v27 = vld [vmem:[#allocation6 + $0x1b0] sm:$0xff] }
 0x2fa   :  { %2597 = vmatprep.subr.mxu1 %v2582_v24 }
 0x2fb   :  { %2598 = vmatpush3.msra.mxu1 %v2582_v24  ;;  %v1057_v24 = vld [vmem:[#allocation6 + $0x1c8] sm:$0xff] }
 0x2fc   :  { %2599 = vmatprep.subr.mxu1 %v550_v25 }
 0x2fd   :  { %2600 = vmatpush3.msra.mxu1 %v550_v25  ;;  %v1056_v25 = vld [vmem:[#allocation6 + $0x1c0] sm:$0xff] }
 0x2fe   :  { %2601 = vmatprep.subr.mxu1 %v2579_v22 }
 0x2ff   :  { %2602 = vmatpush3.msra.mxu1 %v2579_v22  ;;  %v1059_v22 = vld [vmem:[#allocation6 + $0x1d8] sm:$0xff] }
 0x300   :  { %2603 = vmatprep.subr.mxu1 %v540_v23 }
 0x301   :  { %2604 = vmatpush3.msra.mxu1 %v540_v23  ;;  %v1058_v23 = vld [vmem:[#allocation6 + $0x1d0] sm:$0xff] }
 0x302   :  { %2605 = vmatprep.subr.mxu1 %v2576_v20 }
 0x303   :  { %2606 = vmatpush3.msra.mxu1 %v2576_v20  ;;  %v1061_v20 = vld [vmem:[#allocation6 + $0x1e8] sm:$0xff] }
 0x304   :  { %2607 = vmatprep.subr.mxu1 %v530_v21 }
 0x305   :  { %2608 = vmatpush3.msra.mxu1 %v530_v21  ;;  %v1060_v21 = vld [vmem:[#allocation6 + $0x1e0] sm:$0xff] }
 0x306   :  { %2609 = vmatprep.subr.mxu1 %v2573_v18 }
 0x307   :  { %2610 = vmatpush3.msra.mxu1 %v2573_v18  ;;  %v1063_v18 = vld [vmem:[#allocation6 + $0x1f8] sm:$0xff] }
 0x308   :  { %2611 = vmatprep.subr.mxu1 %v520_v19  ;;  %2757 = vmatprep.subr.mxu0 %v1063_v18 }
 0x309   :  { %2612 = vmatpush3.msra.mxu1 %v520_v19  ;;  %v1062_v19 = vld [vmem:[#allocation6 + $0x1f0] sm:$0xff] }
 0x30a   :  { %2613 = vmatprep.subr.mxu1 %v2570_v16 }
 0x30b   :  { %2614 = vmatpush3.msra.mxu1 %v2570_v16 }
 0x30c   :  { %2615 = vmatprep.subr.mxu1 %v510_v17 }
 0x30d   :  { %2616 = vmatpush3.msra.mxu1 %v510_v17 }
 0x30e   :  { %2617 = vmatprep.subr.mxu1 %v2567_v14 }
 0x30f   :  { %2618 = vmatpush3.msra.mxu1 %v2567_v14 }
 0x310   :  { %2619 = vmatprep.subr.mxu1 %v500_v15 }
 0x311   :  { %2620 = vmatpush3.msra.mxu1 %v500_v15 }
 0x312   :  { %2622 = vmatmul.mubr.f32.vlgmr.msra.gmra.mxu1 %v3251_v62 }
 0x313   :  { %2624 = vmatprep.mubr.f32.mxu1 %v3253_v63 }
 0x316   :  { %2625 = vmatmul.mubr.f32.gmra.mxu1 %v3257_v0 }
 0x317   :  { %2627 = vmatprep.mubr.f32.mxu1 %v3259_v1 }
 0x31a   :  { %2628 = vmatmul.mubr.f32.gmra.mxu1 %v3263_v2 }
 0x31b   :  { %2630 = vmatprep.mubr.f32.mxu1 %v3265_v3 }
 0x31e   :  { %2631 = vmatmul.mubr.f32.gmra.mxu1 %v3269_v4 }
 0x31f   :  { %2633 = vmatprep.mubr.f32.mxu1 %v3271_v5 }
 0x322   :  { %2634 = vmatmul.mubr.f32.gmra.mxu1 %v3275_v6 }
 0x323   :  { %2636 = vmatprep.mubr.f32.mxu1 %v3277_v7 }
 0x326   :  { %2637 = vmatmul.mubr.f32.gmra.mxu1 %v3281_v8 }
 0x327   :  { %2639 = vmatprep.mubr.f32.mxu1 %v3283_v9 }
 0x32a   :  { %2640 = vmatmul.mubr.f32.gmra.mxu1 %v3287_v10 }
 0x32b   :  { %2642 = vmatprep.mubr.f32.mxu1 %v3289_v11 }
 0x32e   :  { %2643 = vmatmul.mubr.f32.gmra.mxu1 %v3293_v12 }
 0x32f   :  { %2733 = vmatprep.mubr.f32.mxu1 %v3248_v32 }
 0x3d2   :  { %v2623_v34 = vpop.f32.mrf.mxu1 }
 0x3d3   :  { %v659_v38 = vadd.f32 %v2623_v34, %v2032_v35 }
 0x3d4   :  { %v653_v36 = vpop.f32.mrf.mxu1 }
 0x3d5   :  { %v654_v37 = vadd.f32 %v2032_v35, %v653_v36 }
 0x3d6   :  { %v2626_v39 = vpop.f32.mrf.mxu1 }
 0x3d7   :  { %2677 = vmatprep.mubr.f32.mxu0 %v654_v37  ;;  %v669_v42 = vadd.f32 %v2626_v39, %v2032_v35 }
 0x3d8   :  { %v663_v40 = vpop.f32.mrf.mxu1  ;;  %2678 = vmatmul.mubr.f32.vlgmr.msra.gmra.mxu0 %v659_v38 }
 0x3d9   :  { %v664_v41 = vadd.f32 %v2032_v35, %v663_v40  ;;  %2758 = vmatpush3.msra.mxu0 %v1063_v18 }
 0x3da   :  { %v2629_v43 = vpop.f32.mrf.mxu1  ;;  %2759 = vmatprep.subr.mxu0 %v1062_v19 }
 0x3db   :  { %2680 = vmatprep.mubr.f32.mxu0 %v664_v41  ;;  %v679_v46 = vadd.f32 %v2629_v43, %v2032_v35  ;;  %2760 = vmatpush3.msra.mxu0 %v1062_v19 }
 0x3dc   :  { %v673_v44 = vpop.f32.mrf.mxu1  ;;  %2681 = vmatmul.mubr.f32.gmra.mxu0 %v669_v42  ;;  %2761 = vmatprep.subr.mxu0 %v1061_v20 }
 0x3dd   :  { %v674_v45 = vadd.f32 %v2032_v35, %v673_v44  ;;  %2762 = vmatpush3.msra.mxu0 %v1061_v20 }
 0x3de   :  { %v2632_v47 = vpop.f32.mrf.mxu1  ;;  %2763 = vmatprep.subr.mxu0 %v1060_v21 }
 0x3df   :  { %2683 = vmatprep.mubr.f32.mxu0 %v674_v45  ;;  %v689_v50 = vadd.f32 %v2632_v47, %v2032_v35  ;;  %2764 = vmatpush3.msra.mxu0 %v1060_v21 }
 0x3e0   :  { %v683_v48 = vpop.f32.mrf.mxu1  ;;  %2684 = vmatmul.mubr.f32.gmra.mxu0 %v679_v46  ;;  %2765 = vmatprep.subr.mxu0 %v1059_v22 }
 0x3e1   :  { %v684_v49 = vadd.f32 %v2032_v35, %v683_v48  ;;  %2766 = vmatpush3.msra.mxu0 %v1059_v22  ;;  %v1050_v48 = vld [vmem:[#allocation6 + $0x190] sm:$0xff] }
 0x3e2   :  { %v2635_v51 = vpop.f32.mrf.mxu1  ;;  %2767 = vmatprep.subr.mxu0 %v1058_v23 }
 0x3e3   :  { %2686 = vmatprep.mubr.f32.mxu0 %v684_v49  ;;  %v699_v54 = vadd.f32 %v2635_v51, %v2032_v35  ;;  %2768 = vmatpush3.msra.mxu0 %v1058_v23  ;;  %v1049_v49 = vld [vmem:[#allocation6 + $0x188] sm:$0xff] }
 0x3e4   :  { %v693_v52 = vpop.f32.mrf.mxu1  ;;  %2687 = vmatmul.mubr.f32.gmra.mxu0 %v689_v50  ;;  %2769 = vmatprep.subr.mxu0 %v1057_v24  ;;  %v1048_v50 = vld [vmem:[#allocation6 + $0x180] sm:$0xff] }
 0x3e5   :  { %v694_v53 = vadd.f32 %v2032_v35, %v693_v52  ;;  %2770 = vmatpush3.msra.mxu0 %v1057_v24  ;;  %v2033_v52 = vld [vmem:[#allocation7 + $0x2] ss:$0 sm:$0xff] }
 0x3e6   :  { %v2638_v55 = vpop.f32.mrf.mxu1  ;;  %2771 = vmatprep.subr.mxu0 %v1056_v25 }
 0x3e7   :  { %2689 = vmatprep.mubr.f32.mxu0 %v694_v53  ;;  %v709_v58 = vadd.f32 %v2638_v55, %v2032_v35  ;;  %2772 = vmatpush3.msra.mxu0 %v1056_v25 }
 0x3e8   :  { %v703_v56 = vpop.f32.mrf.mxu1  ;;  %2690 = vmatmul.mubr.f32.gmra.mxu0 %v699_v54  ;;  %2773 = vmatprep.subr.mxu0 %v1055_v26 }
 0x3e9   :  { %v704_v57 = vadd.f32 %v2032_v35, %v703_v56  ;;  %2774 = vmatpush3.msra.mxu0 %v1055_v26 }
 0x3ea   :  { %v2641_v59 = vpop.f32.mrf.mxu1  ;;  %2775 = vmatprep.subr.mxu0 %v1054_v27 }
 0x3eb   :  { %2692 = vmatprep.mubr.f32.mxu0 %v704_v57  ;;  %v719_v13 = vadd.f32 %v2641_v59, %v2032_v35  ;;  %2776 = vmatpush3.msra.mxu0 %v1054_v27 }
 0x3ec   :  { %v713_v60 = vpop.f32.mrf.mxu1  ;;  %2693 = vmatmul.mubr.f32.gmra.mxu0 %v709_v58  ;;  %2777 = vmatprep.subr.mxu0 %v1053_v28 }
 0x3ed   :  { %v714_v61 = vadd.f32 %v2032_v35, %v713_v60  ;;  %2778 = vmatpush3.msra.mxu0 %v1053_v28 }
 0x3ee   :  { %v2644_v14 = vpop.f32.mrf.mxu1  ;;  %2779 = vmatprep.subr.mxu0 %v1052_v29 }
 0x3ef   :  { %2695 = vmatprep.mubr.f32.mxu0 %v714_v61  ;;  %v729_v17 = vadd.f32 %v2644_v14, %v2032_v35  ;;  %2780 = vmatpush3.msra.mxu0 %v1052_v29 }
 0x3f0   :  { %v723_v15 = vpop.f32.mrf.mxu1  ;;  %2696 = vmatmul.mubr.f32.gmra.mxu0 %v719_v13  ;;  %2781 = vmatprep.subr.mxu0 %v1051_v30 }
 0x3f1   :  { %v724_v16 = vadd.f32 %v2032_v35, %v723_v15  ;;  %2782 = vmatpush3.msra.mxu0 %v1051_v30 }
 0x3f2   :  { %2783 = vmatprep.subr.mxu0 %v1050_v48 }
 0x3f3   :  { %2698 = vmatprep.mubr.f32.mxu0 %v724_v16  ;;  %2784 = vmatpush3.msra.mxu0 %v1050_v48 }
 0x3f4   :  { %2699 = vmatmul.mubr.f32.gmra.mxu0 %v729_v17  ;;  %2785 = vmatprep.subr.mxu0 %v1049_v49 }
 0x3f5   :  { %2786 = vmatpush3.msra.mxu0 %v1049_v49 }
 0x3f6   :  { %2787 = vmatprep.subr.mxu0 %v1048_v50 }
 0x3f7   :  { %2788 = vmatpush3.msra.mxu0 %v1048_v50 }
 0x498   :  { %v2679_v31 = vpop.f32.mrf.mxu0 }
 0x49a   :  { %v815_v33 = vpop.f32.mrf.mxu0 }
 0x49c   :  { %v2682_v34 = vpop.f32.mrf.mxu0 }
 0x49e   :  { %v825_v35 = vpop.f32.mrf.mxu0 }
 0x4a0   :  { %v2685_v36 = vpop.f32.mrf.mxu0 }
 0x4a2   :  { %v835_v37 = vpop.f32.mrf.mxu0 }
 0x4a4   :  { %v2688_v38 = vpop.f32.mrf.mxu0 }
 0x4a6   :  { %v845_v39 = vpop.f32.mrf.mxu0 }
 0x4a8   :  { %v2691_v40 = vpop.f32.mrf.mxu0 }
 0x4aa   :  { %v855_v41 = vpop.f32.mrf.mxu0 }
 0x4ac   :  { %v2694_v42 = vpop.f32.mrf.mxu0 }
 0x4ae   :  { %v865_v43 = vpop.f32.mrf.mxu0 }
 0x4b0   :  { %v2697_v44 = vpop.f32.mrf.mxu0 }
 0x4b2   :  { %v875_v45 = vpop.f32.mrf.mxu0 }
 0x4b4   :  { %v2700_v46 = vpop.f32.mrf.mxu0 }
 0x4b5   :  { %2701 = vmatprep.subr.mxu1 %v2700_v46 }
 0x4b6   :  { %v885_v47 = vpop.f32.mrf.mxu0  ;;  %2702 = vmatpush3.msra.mxu1 %v2700_v46  ;;  %v1367_v46 = vld [vmem:[#allocation6 + $0x220] sm:$0xff] }
 0x4b7   :  { %2703 = vmatprep.subr.mxu1 %v885_v47 }
 0x4b8   :  { %2704 = vmatpush3.msra.mxu1 %v885_v47  ;;  %v1366_v47 = vld [vmem:[#allocation6 + $0x218] sm:$0xff] }
 0x4b9   :  { %2705 = vmatprep.subr.mxu1 %v2697_v44 }
 0x4ba   :  { %2706 = vmatpush3.msra.mxu1 %v2697_v44  ;;  %v1369_v44 = vld [vmem:[#allocation6 + $0x230] sm:$0xff] }
 0x4bb   :  { %2707 = vmatprep.subr.mxu1 %v875_v45 }
 0x4bc   :  { %2708 = vmatpush3.msra.mxu1 %v875_v45  ;;  %v1368_v45 = vld [vmem:[#allocation6 + $0x228] sm:$0xff] }
 0x4bd   :  { %2709 = vmatprep.subr.mxu1 %v2694_v42 }
 0x4be   :  { %2710 = vmatpush3.msra.mxu1 %v2694_v42  ;;  %v1371_v42 = vld [vmem:[#allocation6 + $0x240] sm:$0xff] }
 0x4bf   :  { %2711 = vmatprep.subr.mxu1 %v865_v43 }
 0x4c0   :  { %2712 = vmatpush3.msra.mxu1 %v865_v43  ;;  %v1370_v43 = vld [vmem:[#allocation6 + $0x238] sm:$0xff] }
 0x4c1   :  { %2713 = vmatprep.subr.mxu1 %v2691_v40 }
 0x4c2   :  { %2714 = vmatpush3.msra.mxu1 %v2691_v40  ;;  %v1373_v40 = vld [vmem:[#allocation6 + $0x250] sm:$0xff] }
 0x4c3   :  { %2715 = vmatprep.subr.mxu1 %v855_v41 }
 0x4c4   :  { %2716 = vmatpush3.msra.mxu1 %v855_v41  ;;  %v1372_v41 = vld [vmem:[#allocation6 + $0x248] sm:$0xff] }
 0x4c5   :  { %2717 = vmatprep.subr.mxu1 %v2688_v38 }
 0x4c6   :  { %2718 = vmatpush3.msra.mxu1 %v2688_v38  ;;  %v1375_v38 = vld [vmem:[#allocation6 + $0x260] sm:$0xff] }
 0x4c7   :  { %2719 = vmatprep.subr.mxu1 %v845_v39 }
 0x4c8   :  { %2720 = vmatpush3.msra.mxu1 %v845_v39  ;;  %v1374_v39 = vld [vmem:[#allocation6 + $0x258] sm:$0xff] }
 0x4c9   :  { %2721 = vmatprep.subr.mxu1 %v2685_v36 }
 0x4ca   :  { %2722 = vmatpush3.msra.mxu1 %v2685_v36  ;;  %v1377_v36 = vld [vmem:[#allocation6 + $0x270] sm:$0xff] }
 0x4cb   :  { %2723 = vmatprep.subr.mxu1 %v835_v37 }
 0x4cc   :  { %2724 = vmatpush3.msra.mxu1 %v835_v37  ;;  %v1376_v37 = vld [vmem:[#allocation6 + $0x268] sm:$0xff] }
 0x4cd   :  { %2725 = vmatprep.subr.mxu1 %v2682_v34 }
 0x4ce   :  { %2726 = vmatpush3.msra.mxu1 %v2682_v34 }
 0x4cf   :  { %2727 = vmatprep.subr.mxu1 %v825_v35 }
 0x4d0   :  { %2728 = vmatpush3.msra.mxu1 %v825_v35  ;;  %v1378_v35 = vld [vmem:[#allocation6 + $0x278] sm:$0xff] }
 0x4d1   :  { %2729 = vmatprep.subr.mxu1 %v2679_v31  ;;  %2869 = vmatprep.subr.mxu0 %v1378_v35 }
 0x4d2   :  { %2730 = vmatpush3.msra.mxu1 %v2679_v31 }
 0x4d3   :  { %2731 = vmatprep.subr.mxu1 %v815_v33 }
 0x4d4   :  { %2732 = vmatpush3.msra.mxu1 %v815_v33 }
 0x4d5   :  { %2734 = vmatmul.mubr.f32.vlgmr.msra.gmra.mxu1 %v3251_v62 }
 0x4d6   :  { %2736 = vmatprep.mubr.f32.mxu1 %v3253_v63 }
 0x4d9   :  { %2737 = vmatmul.mubr.f32.gmra.mxu1 %v3257_v0 }
 0x4da   :  { %2739 = vmatprep.mubr.f32.mxu1 %v3259_v1 }
 0x4dd   :  { %2740 = vmatmul.mubr.f32.gmra.mxu1 %v3263_v2 }
 0x4de   :  { %2742 = vmatprep.mubr.f32.mxu1 %v3265_v3 }
 0x4e1   :  { %2743 = vmatmul.mubr.f32.gmra.mxu1 %v3269_v4 }
 0x4e2   :  { %2745 = vmatprep.mubr.f32.mxu1 %v3271_v5 }
 0x4e5   :  { %2746 = vmatmul.mubr.f32.gmra.mxu1 %v3275_v6 }
 0x4e6   :  { %2748 = vmatprep.mubr.f32.mxu1 %v3277_v7 }
 0x4e9   :  { %2749 = vmatmul.mubr.f32.gmra.mxu1 %v3281_v8 }
 0x4ea   :  { %2751 = vmatprep.mubr.f32.mxu1 %v3283_v9 }
 0x4ed   :  { %2752 = vmatmul.mubr.f32.gmra.mxu1 %v3287_v10 }
 0x4ee   :  { %2754 = vmatprep.mubr.f32.mxu1 %v3289_v11 }
 0x4f1   :  { %2755 = vmatmul.mubr.f32.gmra.mxu1 %v3293_v12 }
 0x4f2   :  { %2845 = vmatprep.mubr.f32.mxu1 %v3248_v32 }
 0x595   :  { %v2735_v51 = vpop.f32.mrf.mxu1 }
 0x596   :  { %v974_v55 = vadd.f32 %v2735_v51, %v2033_v52 }
 0x597   :  { %v968_v53 = vpop.f32.mrf.mxu1 }
 0x598   :  { %v969_v54 = vadd.f32 %v2033_v52, %v968_v53 }
 0x599   :  { %v2738_v56 = vpop.f32.mrf.mxu1 }
 0x59a   :  { %2789 = vmatprep.mubr.f32.mxu0 %v969_v54  ;;  %v984_v32 = vadd.f32 %v2738_v56, %v2033_v52 }
 0x59b   :  { %v978_v57 = vpop.f32.mrf.mxu1  ;;  %2790 = vmatmul.mubr.f32.vlgmr.msra.gmra.mxu0 %v974_v55 }
 0x59c   :  { %v979_v58 = vadd.f32 %v2033_v52, %v978_v57  ;;  %2870 = vmatpush3.msra.mxu0 %v1378_v35 }
 0x59d   :  { %v2741_v59 = vpop.f32.mrf.mxu1  ;;  %2871 = vmatprep.subr.mxu0 %v1377_v36 }
 0x59e   :  { %2792 = vmatprep.mubr.f32.mxu0 %v979_v58  ;;  %v994_v13 = vadd.f32 %v2741_v59, %v2033_v52  ;;  %2872 = vmatpush3.msra.mxu0 %v1377_v36 }
 0x59f   :  { %v988_v60 = vpop.f32.mrf.mxu1  ;;  %2793 = vmatmul.mubr.f32.gmra.mxu0 %v984_v32  ;;  %2873 = vmatprep.subr.mxu0 %v1376_v37 }
 0x5a0   :  { %v989_v61 = vadd.f32 %v2033_v52, %v988_v60  ;;  %2874 = vmatpush3.msra.mxu0 %v1376_v37  ;;  %v1693_v37 = vld [vmem:[#allocation6 + $0x2f8] sm:$0xff] }
 0x5a1   :  { %v2744_v14 = vpop.f32.mrf.mxu1  ;;  %2875 = vmatprep.subr.mxu0 %v1375_v38 }
 0x5a2   :  { %2795 = vmatprep.mubr.f32.mxu0 %v989_v61  ;;  %v1004_v17 = vadd.f32 %v2744_v14, %v2033_v52  ;;  %2876 = vmatpush3.msra.mxu0 %v1375_v38  ;;  %v1692_v38 = vld [vmem:[#allocation6 + $0x2f0] sm:$0xff] }
 0x5a3   :  { %v998_v15 = vpop.f32.mrf.mxu1  ;;  %2796 = vmatmul.mubr.f32.gmra.mxu0 %v994_v13  ;;  %2877 = vmatprep.subr.mxu0 %v1374_v39 }
 0x5a4   :  { %v999_v16 = vadd.f32 %v2033_v52, %v998_v15  ;;  %2878 = vmatpush3.msra.mxu0 %v1374_v39  ;;  %v1691_v39 = vld [vmem:[#allocation6 + $0x2e8] sm:$0xff] }
 0x5a5   :  { %v2747_v18 = vpop.f32.mrf.mxu1  ;;  %2879 = vmatprep.subr.mxu0 %v1373_v40 }
 0x5a6   :  { %2798 = vmatprep.mubr.f32.mxu0 %v999_v16  ;;  %v1014_v21 = vadd.f32 %v2747_v18, %v2033_v52  ;;  %2880 = vmatpush3.msra.mxu0 %v1373_v40  ;;  %v1690_v40 = vld [vmem:[#allocation6 + $0x2e0] sm:$0xff] }
 0x5a7   :  { %v1008_v19 = vpop.f32.mrf.mxu1  ;;  %2799 = vmatmul.mubr.f32.gmra.mxu0 %v1004_v17  ;;  %2881 = vmatprep.subr.mxu0 %v1372_v41 }
 0x5a8   :  { %v1009_v20 = vadd.f32 %v2033_v52, %v1008_v19  ;;  %2882 = vmatpush3.msra.mxu0 %v1372_v41  ;;  %v1689_v41 = vld [vmem:[#allocation6 + $0x2d8] sm:$0xff] }
 0x5a9   :  { %v2750_v22 = vpop.f32.mrf.mxu1  ;;  %2883 = vmatprep.subr.mxu0 %v1371_v42 }
 0x5aa   :  { %2801 = vmatprep.mubr.f32.mxu0 %v1009_v20  ;;  %v1024_v25 = vadd.f32 %v2750_v22, %v2033_v52  ;;  %2884 = vmatpush3.msra.mxu0 %v1371_v42  ;;  %v1688_v42 = vld [vmem:[#allocation6 + $0x2d0] sm:$0xff] }
 0x5ab   :  { %v1018_v23 = vpop.f32.mrf.mxu1  ;;  %2802 = vmatmul.mubr.f32.gmra.mxu0 %v1014_v21  ;;  %2885 = vmatprep.subr.mxu0 %v1370_v43 }
 0x5ac   :  { %v1019_v24 = vadd.f32 %v2033_v52, %v1018_v23  ;;  %2886 = vmatpush3.msra.mxu0 %v1370_v43  ;;  %v1687_v43 = vld [vmem:[#allocation6 + $0x2c8] sm:$0xff] }
 0x5ad   :  { %v2753_v26 = vpop.f32.mrf.mxu1  ;;  %2887 = vmatprep.subr.mxu0 %v1369_v44 }
 0x5ae   :  { %2804 = vmatprep.mubr.f32.mxu0 %v1019_v24  ;;  %v1034_v29 = vadd.f32 %v2753_v26, %v2033_v52  ;;  %2888 = vmatpush3.msra.mxu0 %v1369_v44  ;;  %v1686_v44 = vld [vmem:[#allocation6 + $0x2c0] sm:$0xff] }
 0x5af   :  { %v1028_v27 = vpop.f32.mrf.mxu1  ;;  %2805 = vmatmul.mubr.f32.gmra.mxu0 %v1024_v25  ;;  %2889 = vmatprep.subr.mxu0 %v1368_v45 }
 0x5b0   :  { %v1029_v28 = vadd.f32 %v2033_v52, %v1028_v27  ;;  %2890 = vmatpush3.msra.mxu0 %v1368_v45  ;;  %v1685_v45 = vld [vmem:[#allocation6 + $0x2b8] sm:$0xff] }
 0x5b1   :  { %v2756_v30 = vpop.f32.mrf.mxu1  ;;  %2891 = vmatprep.subr.mxu0 %v1367_v46 }
 0x5b2   :  { %2807 = vmatprep.mubr.f32.mxu0 %v1029_v28  ;;  %v1044_v34 = vadd.f32 %v2756_v30, %v2033_v52  ;;  %2892 = vmatpush3.msra.mxu0 %v1367_v46  ;;  %v1684_v46 = vld [vmem:[#allocation6 + $0x2b0] sm:$0xff] }
 0x5b3   :  { %v1038_v31 = vpop.f32.mrf.mxu1  ;;  %2808 = vmatmul.mubr.f32.gmra.mxu0 %v1034_v29  ;;  %2893 = vmatprep.subr.mxu0 %v1366_v47 }
 0x5b4   :  { %v1039_v33 = vadd.f32 %v2033_v52, %v1038_v31  ;;  %2894 = vmatpush3.msra.mxu0 %v1366_v47  ;;  %v1683_v47 = vld [vmem:[#allocation6 + $0x2a8] sm:$0xff] }
 0x5b6   :  { %2810 = vmatprep.mubr.f32.mxu0 %v1039_v33 }
 0x5b7   :  { %2811 = vmatmul.mubr.f32.gmra.mxu0 %v1044_v34 }
 0x65b   :  { %v2791_v48 = vpop.f32.mrf.mxu0 }
 0x65d   :  { %v1130_v49 = vpop.f32.mrf.mxu0 }
 0x65f   :  { %v2794_v50 = vpop.f32.mrf.mxu0 }
 0x661   :  { %v1140_v51 = vpop.f32.mrf.mxu0 }
 0x663   :  { %v2797_v52 = vpop.f32.mrf.mxu0 }
 0x665   :  { %v1150_v53 = vpop.f32.mrf.mxu0 }
 0x667   :  { %v2800_v54 = vpop.f32.mrf.mxu0 }
 0x669   :  { %v1160_v55 = vpop.f32.mrf.mxu0 }
 0x66b   :  { %v2803_v56 = vpop.f32.mrf.mxu0 }
 0x66d   :  { %v1170_v57 = vpop.f32.mrf.mxu0 }
 0x66f   :  { %v2806_v58 = vpop.f32.mrf.mxu0 }
 0x671   :  { %v1180_v32 = vpop.f32.mrf.mxu0 }
 0x673   :  { %v2809_v59 = vpop.f32.mrf.mxu0 }
 0x675   :  { %v1190_v60 = vpop.f32.mrf.mxu0 }
 0x677   :  { %v2812_v61 = vpop.f32.mrf.mxu0 }
 0x678   :  { %2813 = vmatprep.subr.mxu1 %v2812_v61 }
 0x679   :  { %v1200_v13 = vpop.f32.mrf.mxu0  ;;  %2814 = vmatpush3.msra.mxu1 %v2812_v61 }
 0x67a   :  { %2815 = vmatprep.subr.mxu1 %v1200_v13 }
 0x67b   :  { %2816 = vmatpush3.msra.mxu1 %v1200_v13 }
 0x67c   :  { %2817 = vmatprep.subr.mxu1 %v2809_v59 }
 0x67d   :  { %2818 = vmatpush3.msra.mxu1 %v2809_v59 }
 0x67e   :  { %2819 = vmatprep.subr.mxu1 %v1190_v60 }
 0x67f   :  { %2820 = vmatpush3.msra.mxu1 %v1190_v60 }
 0x680   :  { %2821 = vmatprep.subr.mxu1 %v2806_v58 }
 0x681   :  { %2822 = vmatpush3.msra.mxu1 %v2806_v58 }
 0x682   :  { %2823 = vmatprep.subr.mxu1 %v1180_v32 }
 0x683   :  { %2824 = vmatpush3.msra.mxu1 %v1180_v32 }
 0x684   :  { %2825 = vmatprep.subr.mxu1 %v2803_v56 }
 0x685   :  { %2826 = vmatpush3.msra.mxu1 %v2803_v56 }
 0x686   :  { %2827 = vmatprep.subr.mxu1 %v1170_v57 }
 0x687   :  { %2828 = vmatpush3.msra.mxu1 %v1170_v57 }
 0x688   :  { %2829 = vmatprep.subr.mxu1 %v2800_v54 }
 0x689   :  { %2830 = vmatpush3.msra.mxu1 %v2800_v54 }
 0x68a   :  { %2831 = vmatprep.subr.mxu1 %v1160_v55 }
 0x68b   :  { %2832 = vmatpush3.msra.mxu1 %v1160_v55 }
 0x68c   :  { %2833 = vmatprep.subr.mxu1 %v2797_v52 }
 0x68d   :  { %2834 = vmatpush3.msra.mxu1 %v2797_v52 }
 0x68e   :  { %2835 = vmatprep.subr.mxu1 %v1150_v53 }
 0x68f   :  { %2836 = vmatpush3.msra.mxu1 %v1150_v53 }
 0x690   :  { %2837 = vmatprep.subr.mxu1 %v2794_v50 }
 0x691   :  { %2838 = vmatpush3.msra.mxu1 %v2794_v50 }
 0x692   :  { %2839 = vmatprep.subr.mxu1 %v1140_v51 }
 0x693   :  { %2840 = vmatpush3.msra.mxu1 %v1140_v51 }
 0x694   :  { %2841 = vmatprep.subr.mxu1 %v2791_v48 }
 0x695   :  { %2842 = vmatpush3.msra.mxu1 %v2791_v48  ;;  %v1682_v48 = vld [vmem:[#allocation6 + $0x2a0] sm:$0xff] }
 0x696   :  { %2843 = vmatprep.subr.mxu1 %v1130_v49 }
 0x697   :  { %2844 = vmatpush3.msra.mxu1 %v1130_v49  ;;  %v1681_v49 = vld [vmem:[#allocation6 + $0x298] sm:$0xff] }
 0x698   :  { %2846 = vmatmul.mubr.f32.vlgmr.msra.gmra.mxu1 %v3251_v62  ;;  %v3344_v62 = vld [vmem:[#allocation2] sm:$0xff] }
 0x699   :  { %2848 = vmatprep.mubr.f32.mxu1 %v3253_v63  ;;  %v1365_v63 = vld [vmem:[#allocation6 + $0x210] sm:$0xff] }
 0x69a   :  { %2895 = vmatprep.subr.mxu0 %v1365_v63 }
 0x69b   :  { %2896 = vmatpush3.msra.mxu0 %v1365_v63 }
 0x69c   :  { %2849 = vmatmul.mubr.f32.gmra.mxu1 %v3257_v0  ;;  %v1364_v0 = vld [vmem:[#allocation6 + $0x208] sm:$0xff] }
 0x69d   :  { %2851 = vmatprep.mubr.f32.mxu1 %v3259_v1  ;;  %2897 = vmatprep.subr.mxu0 %v1364_v0  ;;  %v1363_v1 = vld [vmem:[#allocation6 + $0x200] sm:$0xff] }
 0x69e   :  { %2898 = vmatpush3.msra.mxu0 %v1364_v0 }
 0x69f   :  { %2899 = vmatprep.subr.mxu0 %v1363_v1 }
 0x6a0   :  { %2852 = vmatmul.mubr.f32.gmra.mxu1 %v3263_v2  ;;  %2900 = vmatpush3.msra.mxu0 %v1363_v1  ;;  %v3347_v1 = vld [vmem:[#allocation2 + $0x8] sm:$0xff] }
 0x6a1   :  { %2854 = vmatprep.mubr.f32.mxu1 %v3265_v3  ;;  %v2034_v3 = vld [vmem:[#allocation7 + $0x3] ss:$0 sm:$0xff]  ;;  %2981 = vmatprep.subr.mxu0 %v1693_v37 }
 0x6a4   :  { %2855 = vmatmul.mubr.f32.gmra.mxu1 %v3269_v4 }
 0x6a5   :  { %2857 = vmatprep.mubr.f32.mxu1 %v3271_v5 }
 0x6a8   :  { %2858 = vmatmul.mubr.f32.gmra.mxu1 %v3275_v6 }
 0x6a9   :  { %2860 = vmatprep.mubr.f32.mxu1 %v3277_v7 }
 0x6ac   :  { %2861 = vmatmul.mubr.f32.gmra.mxu1 %v3281_v8 }
 0x6ad   :  { %2863 = vmatprep.mubr.f32.mxu1 %v3283_v9 }
 0x6b0   :  { %2864 = vmatmul.mubr.f32.gmra.mxu1 %v3287_v10 }
 0x6b1   :  { %2866 = vmatprep.mubr.f32.mxu1 %v3289_v11 }
 0x6b4   :  { %2867 = vmatmul.mubr.f32.gmra.mxu1 %v3293_v12 }
 0x6b5   :  { %2957 = vmatprep.mubr.f32.mxu1 %v3344_v62 }
 0x758   :  { %v2847_v2 = vpop.f32.mrf.mxu1 }
 0x759   :  { %v1289_v6 = vadd.f32 %v2847_v2, %v2034_v3  ;;  %v3350_v2 = vld [vmem:[#allocation2 + $0x10] sm:$0xff] }
 0x75a   :  { %v1283_v4 = vpop.f32.mrf.mxu1 }
 0x75b   :  { %v1284_v5 = vadd.f32 %v2034_v3, %v1283_v4  ;;  %v3356_v4 = vld [vmem:[#allocation2 + $0x20] sm:$0xff] }
 0x75c   :  { %v2850_v7 = vpop.f32.mrf.mxu1 }
 0x75d   :  { %2901 = vmatprep.mubr.f32.mxu0 %v1284_v5  ;;  %v1299_v10 = vadd.f32 %v2850_v7, %v2034_v3  ;;  %v3359_v5 = vld [vmem:[#allocation2 + $0x28] sm:$0xff]  ;;  %v3365_v7 = vld [vmem:[#allocation2 + $0x38] sm:$0xff] }
 0x75e   :  { %v1293_v8 = vpop.f32.mrf.mxu1  ;;  %2902 = vmatmul.mubr.f32.vlgmr.msra.gmra.mxu0 %v1289_v6  ;;  %v3362_v6 = vld [vmem:[#allocation2 + $0x30] sm:$0xff] }
 0x75f   :  { %v1294_v9 = vadd.f32 %v2034_v3, %v1293_v8  ;;  %2982 = vmatpush3.msra.mxu0 %v1693_v37  ;;  %v3368_v8 = vld [vmem:[#allocation2 + $0x40] sm:$0xff] }
 0x760   :  { %v2853_v11 = vpop.f32.mrf.mxu1  ;;  %2983 = vmatprep.subr.mxu0 %v1692_v38 }
 0x761   :  { %2904 = vmatprep.mubr.f32.mxu0 %v1294_v9  ;;  %v1309_v15 = vadd.f32 %v2853_v11, %v2034_v3  ;;  %2984 = vmatpush3.msra.mxu0 %v1692_v38  ;;  %v3371_v9 = vld [vmem:[#allocation2 + $0x48] sm:$0xff]  ;;  %v3377_v11 = vld [vmem:[#allocation2 + $0x58] sm:$0xff] }
 0x762   :  { %v1303_v12 = vpop.f32.mrf.mxu1  ;;  %2905 = vmatmul.mubr.f32.gmra.mxu0 %v1299_v10  ;;  %2985 = vmatprep.subr.mxu0 %v1691_v39  ;;  %v3374_v10 = vld [vmem:[#allocation2 + $0x50] sm:$0xff] }
 0x763   :  { %v1304_v14 = vadd.f32 %v2034_v3, %v1303_v12  ;;  %2986 = vmatpush3.msra.mxu0 %v1691_v39  ;;  %v3380_v12 = vld [vmem:[#allocation2 + $0x60] sm:$0xff] }
 0x764   :  { %v2856_v16 = vpop.f32.mrf.mxu1  ;;  %2987 = vmatprep.subr.mxu0 %v1690_v40 }
 0x765   :  { %2907 = vmatprep.mubr.f32.mxu0 %v1304_v14  ;;  %v1319_v19 = vadd.f32 %v2856_v16, %v2034_v3  ;;  %2988 = vmatpush3.msra.mxu0 %v1690_v40  ;;  %v3383_v14 = vld [vmem:[#allocation2 + $0x68] sm:$0xff]  ;;  %v3389_v16 = vld [vmem:[#allocation2 + $0x78] sm:$0xff] }
 0x766   :  { %v1313_v17 = vpop.f32.mrf.mxu1  ;;  %2908 = vmatmul.mubr.f32.gmra.mxu0 %v1309_v15  ;;  %2989 = vmatprep.subr.mxu0 %v1689_v41  ;;  %v3386_v15 = vld [vmem:[#allocation2 + $0x70] sm:$0xff] }
 0x767   :  { %v1314_v18 = vadd.f32 %v2034_v3, %v1313_v17  ;;  %2990 = vmatpush3.msra.mxu0 %v1689_v41  ;;  %v1680_v17 = vld [vmem:[#allocation6 + $0x290] sm:$0xff] }
 0x768   :  { %v2859_v20 = vpop.f32.mrf.mxu1  ;;  %2991 = vmatprep.subr.mxu0 %v1688_v42 }
 0x769   :  { %2910 = vmatprep.mubr.f32.mxu0 %v1314_v18  ;;  %v1329_v23 = vadd.f32 %v2859_v20, %v2034_v3  ;;  %2992 = vmatpush3.msra.mxu0 %v1688_v42  ;;  %v1679_v18 = vld [vmem:[#allocation6 + $0x288] sm:$0xff] }
 0x76a   :  { %v1323_v21 = vpop.f32.mrf.mxu1  ;;  %2911 = vmatmul.mubr.f32.gmra.mxu0 %v1319_v19  ;;  %2993 = vmatprep.subr.mxu0 %v1687_v43  ;;  %v1678_v19 = vld [vmem:[#allocation6 + $0x280] sm:$0xff] }
 0x76b   :  { %v1324_v22 = vadd.f32 %v2034_v3, %v1323_v21  ;;  %2994 = vmatpush3.msra.mxu0 %v1687_v43  ;;  %v2035_v21 = vld [vmem:[#allocation7 + $0x4] ss:$0 sm:$0xff] }
 0x76c   :  { %v2862_v24 = vpop.f32.mrf.mxu1  ;;  %2995 = vmatprep.subr.mxu0 %v1686_v44 }
 0x76d   :  { %2913 = vmatprep.mubr.f32.mxu0 %v1324_v22  ;;  %v1339_v27 = vadd.f32 %v2862_v24, %v2034_v3  ;;  %2996 = vmatpush3.msra.mxu0 %v1686_v44 }
 0x76e   :  { %v1333_v25 = vpop.f32.mrf.mxu1  ;;  %2914 = vmatmul.mubr.f32.gmra.mxu0 %v1329_v23  ;;  %2997 = vmatprep.subr.mxu0 %v1685_v45 }
 0x76f   :  { %v1334_v26 = vadd.f32 %v2034_v3, %v1333_v25  ;;  %2998 = vmatpush3.msra.mxu0 %v1685_v45 }
 0x770   :  { %v2865_v28 = vpop.f32.mrf.mxu1  ;;  %2999 = vmatprep.subr.mxu0 %v1684_v46 }
 0x771   :  { %2916 = vmatprep.mubr.f32.mxu0 %v1334_v26  ;;  %v1349_v31 = vadd.f32 %v2865_v28, %v2034_v3  ;;  %3000 = vmatpush3.msra.mxu0 %v1684_v46 }
 0x772   :  { %v1343_v29 = vpop.f32.mrf.mxu1  ;;  %2917 = vmatmul.mubr.f32.gmra.mxu0 %v1339_v27  ;;  %3001 = vmatprep.subr.mxu0 %v1683_v47 }
 0x773   :  { %v1344_v30 = vadd.f32 %v2034_v3, %v1343_v29  ;;  %3002 = vmatpush3.msra.mxu0 %v1683_v47 }
 0x774   :  { %v2868_v33 = vpop.f32.mrf.mxu1  ;;  %3003 = vmatprep.subr.mxu0 %v1682_v48 }
 0x775   :  { %2919 = vmatprep.mubr.f32.mxu0 %v1344_v30  ;;  %v1359_v36 = vadd.f32 %v2868_v33, %v2034_v3  ;;  %3004 = vmatpush3.msra.mxu0 %v1682_v48 }
 0x776   :  { %v1353_v34 = vpop.f32.mrf.mxu1  ;;  %2920 = vmatmul.mubr.f32.gmra.mxu0 %v1349_v31  ;;  %3005 = vmatprep.subr.mxu0 %v1681_v49 }
 0x777   :  { %v1354_v35 = vadd.f32 %v2034_v3, %v1353_v34  ;;  %3006 = vmatpush3.msra.mxu0 %v1681_v49  ;;  %v3353_v3 = vld [vmem:[#allocation2 + $0x18] sm:$0xff] }
 0x778   :  { %3007 = vmatprep.subr.mxu0 %v1680_v17 }
 0x779   :  { %2922 = vmatprep.mubr.f32.mxu0 %v1354_v35  ;;  %3008 = vmatpush3.msra.mxu0 %v1680_v17 }
 0x77a   :  { %2923 = vmatmul.mubr.f32.gmra.mxu0 %v1359_v36  ;;  %3009 = vmatprep.subr.mxu0 %v1679_v18 }
 0x77b   :  { %3010 = vmatpush3.msra.mxu0 %v1679_v18 }
 0x77c   :  { %3011 = vmatprep.subr.mxu0 %v1678_v19 }
 0x77d   :  { %3012 = vmatpush3.msra.mxu0 %v1678_v19 }
 0x81e   :  { %v2903_v50 = vpop.f32.mrf.mxu0 }
 0x820   :  { %v1445_v51 = vpop.f32.mrf.mxu0 }
 0x822   :  { %v2906_v52 = vpop.f32.mrf.mxu0 }
 0x824   :  { %v1455_v53 = vpop.f32.mrf.mxu0 }
 0x826   :  { %v2909_v54 = vpop.f32.mrf.mxu0 }
 0x828   :  { %v1465_v55 = vpop.f32.mrf.mxu0 }
 0x82a   :  { %v2912_v56 = vpop.f32.mrf.mxu0 }
 0x82c   :  { %v1475_v57 = vpop.f32.mrf.mxu0 }
 0x82e   :  { %v2915_v58 = vpop.f32.mrf.mxu0 }
 0x830   :  { %v1485_v32 = vpop.f32.mrf.mxu0 }
 0x832   :  { %v2918_v59 = vpop.f32.mrf.mxu0 }
 0x834   :  { %v1495_v60 = vpop.f32.mrf.mxu0 }
 0x836   :  { %v2921_v61 = vpop.f32.mrf.mxu0 }
 0x838   :  { %v1505_v13 = vpop.f32.mrf.mxu0 }
 0x83a   :  { %v2924_v63 = vpop.f32.mrf.mxu0 }
 0x83b   :  { %2925 = vmatprep.subr.mxu1 %v2924_v63 }
 0x83c   :  { %v1515_v0 = vpop.f32.mrf.mxu0  ;;  %2926 = vmatpush3.msra.mxu1 %v2924_v63 }
 0x83d   :  { %2927 = vmatprep.subr.mxu1 %v1515_v0 }
 0x83e   :  { %2928 = vmatpush3.msra.mxu1 %v1515_v0 }
 0x83f   :  { %2929 = vmatprep.subr.mxu1 %v2921_v61 }
 0x840   :  { %2930 = vmatpush3.msra.mxu1 %v2921_v61 }
 0x841   :  { %2931 = vmatprep.subr.mxu1 %v1505_v13 }
 0x842   :  { %2932 = vmatpush3.msra.mxu1 %v1505_v13 }
 0x843   :  { %2933 = vmatprep.subr.mxu1 %v2918_v59 }
 0x844   :  { %2934 = vmatpush3.msra.mxu1 %v2918_v59 }
 0x845   :  { %2935 = vmatprep.subr.mxu1 %v1495_v60 }
 0x846   :  { %2936 = vmatpush3.msra.mxu1 %v1495_v60 }
 0x847   :  { %2937 = vmatprep.subr.mxu1 %v2915_v58 }
 0x848   :  { %2938 = vmatpush3.msra.mxu1 %v2915_v58 }
 0x849   :  { %2939 = vmatprep.subr.mxu1 %v1485_v32 }
 0x84a   :  { %2940 = vmatpush3.msra.mxu1 %v1485_v32 }
 0x84b   :  { %2941 = vmatprep.subr.mxu1 %v2912_v56 }
 0x84c   :  { %2942 = vmatpush3.msra.mxu1 %v2912_v56 }
 0x84d   :  { %2943 = vmatprep.subr.mxu1 %v1475_v57 }
 0x84e   :  { %2944 = vmatpush3.msra.mxu1 %v1475_v57 }
 0x84f   :  { %2945 = vmatprep.subr.mxu1 %v2909_v54 }
 0x850   :  { %2946 = vmatpush3.msra.mxu1 %v2909_v54 }
 0x851   :  { %2947 = vmatprep.subr.mxu1 %v1465_v55 }
 0x852   :  { %2948 = vmatpush3.msra.mxu1 %v1465_v55 }
 0x853   :  { %2949 = vmatprep.subr.mxu1 %v2906_v52 }
 0x854   :  { %2950 = vmatpush3.msra.mxu1 %v2906_v52 }
 0x855   :  { %2951 = vmatprep.subr.mxu1 %v1455_v53 }
 0x856   :  { %2952 = vmatpush3.msra.mxu1 %v1455_v53 }
 0x857   :  { %2953 = vmatprep.subr.mxu1 %v2903_v50 }
 0x858   :  { %2954 = vmatpush3.msra.mxu1 %v2903_v50 }
 0x859   :  { %2955 = vmatprep.subr.mxu1 %v1445_v51 }
 0x85a   :  { %2956 = vmatpush3.msra.mxu1 %v1445_v51 }
 0x85b   :  { %2958 = vmatmul.mubr.f32.vlgmr.msra.gmra.mxu1 %v3347_v1 }
 0x85c   :  { %2960 = vmatprep.mubr.f32.mxu1 %v3350_v2 }
 0x85f   :  { %2961 = vmatmul.mubr.f32.gmra.mxu1 %v3353_v3 }
 0x860   :  { %2963 = vmatprep.mubr.f32.mxu1 %v3356_v4 }
 0x863   :  { %2964 = vmatmul.mubr.f32.gmra.mxu1 %v3359_v5 }
 0x864   :  { %2966 = vmatprep.mubr.f32.mxu1 %v3362_v6 }
 0x867   :  { %2967 = vmatmul.mubr.f32.gmra.mxu1 %v3365_v7 }
 0x868   :  { %2969 = vmatprep.mubr.f32.mxu1 %v3368_v8 }
 0x86b   :  { %2970 = vmatmul.mubr.f32.gmra.mxu1 %v3371_v9 }
 0x86c   :  { %2972 = vmatprep.mubr.f32.mxu1 %v3374_v10 }
 0x86f   :  { %2973 = vmatmul.mubr.f32.gmra.mxu1 %v3377_v11 }
 0x870   :  { %2975 = vmatprep.mubr.f32.mxu1 %v3380_v12 }
 0x873   :  { %2976 = vmatmul.mubr.f32.gmra.mxu1 %v3383_v14 }
 0x874   :  { %2978 = vmatprep.mubr.f32.mxu1 %v3386_v15 }
 0x877   :  { %2979 = vmatmul.mubr.f32.gmra.mxu1 %v3389_v16 }
 0x878   :  { %3069 = vmatprep.mubr.f32.mxu1 %v3344_v62 }
 0x91b   :  { %v2959_v20 = vpop.f32.mrf.mxu1 }
 0x91c   :  { %v1604_v24 = vadd.f32 %v2959_v20, %v2035_v21 }
 0x91d   :  { %v1598_v22 = vpop.f32.mrf.mxu1 }
 0x91e   :  { %v1599_v23 = vadd.f32 %v2035_v21, %v1598_v22 }
 0x91f   :  { %v2962_v25 = vpop.f32.mrf.mxu1 }
 0x920   :  { %3013 = vmatprep.mubr.f32.mxu0 %v1599_v23  ;;  %v1614_v62 = vadd.f32 %v2962_v25, %v2035_v21 }
 0x921   :  { %v1608_v26 = vpop.f32.mrf.mxu1  ;;  %3014 = vmatmul.mubr.f32.vlgmr.msra.gmra.mxu0 %v1604_v24 }
 0x922   :  { %v1609_v27 = vadd.f32 %v2035_v21, %v1608_v26 }
 0x923   :  { %v2965_v28 = vpop.f32.mrf.mxu1 }
 0x924   :  { %3016 = vmatprep.mubr.f32.mxu0 %v1609_v27  ;;  %v1624_v31 = vadd.f32 %v2965_v28, %v2035_v21 }
 0x925   :  { %v1618_v29 = vpop.f32.mrf.mxu1  ;;  %3017 = vmatmul.mubr.f32.gmra.mxu0 %v1614_v62 }
 0x926   :  { %v1619_v30 = vadd.f32 %v2035_v21, %v1618_v29 }
 0x927   :  { %v2968_v33 = vpop.f32.mrf.mxu1 }
 0x928   :  { %3019 = vmatprep.mubr.f32.mxu0 %v1619_v30  ;;  %v1634_v36 = vadd.f32 %v2968_v33, %v2035_v21 }
 0x929   :  { %v1628_v34 = vpop.f32.mrf.mxu1  ;;  %3020 = vmatmul.mubr.f32.gmra.mxu0 %v1624_v31 }
 0x92a   :  { %v1629_v35 = vadd.f32 %v2035_v21, %v1628_v34 }
 0x92b   :  { %v2971_v37 = vpop.f32.mrf.mxu1 }
 0x92c   :  { %3022 = vmatprep.mubr.f32.mxu0 %v1629_v35  ;;  %v1644_v40 = vadd.f32 %v2971_v37, %v2035_v21 }
 0x92d   :  { %v1638_v38 = vpop.f32.mrf.mxu1  ;;  %3023 = vmatmul.mubr.f32.gmra.mxu0 %v1634_v36 }
 0x92e   :  { %v1639_v39 = vadd.f32 %v2035_v21, %v1638_v38 }
 0x92f   :  { %v2974_v41 = vpop.f32.mrf.mxu1 }
 0x930   :  { %3025 = vmatprep.mubr.f32.mxu0 %v1639_v39  ;;  %v1654_v44 = vadd.f32 %v2974_v41, %v2035_v21 }
 0x931   :  { %v1648_v42 = vpop.f32.mrf.mxu1  ;;  %3026 = vmatmul.mubr.f32.gmra.mxu0 %v1644_v40 }
 0x932   :  { %v1649_v43 = vadd.f32 %v2035_v21, %v1648_v42 }
 0x933   :  { %v2977_v45 = vpop.f32.mrf.mxu1 }
 0x934   :  { %3028 = vmatprep.mubr.f32.mxu0 %v1649_v43  ;;  %v1664_v48 = vadd.f32 %v2977_v45, %v2035_v21 }
 0x935   :  { %v1658_v46 = vpop.f32.mrf.mxu1  ;;  %3029 = vmatmul.mubr.f32.gmra.mxu0 %v1654_v44 }
 0x936   :  { %v1659_v47 = vadd.f32 %v2035_v21, %v1658_v46 }
 0x937   :  { %v2980_v49 = vpop.f32.mrf.mxu1 }
 0x938   :  { %3031 = vmatprep.mubr.f32.mxu0 %v1659_v47  ;;  %v1674_v52 = vadd.f32 %v2980_v49, %v2035_v21 }
 0x939   :  { %v1668_v50 = vpop.f32.mrf.mxu1  ;;  %3032 = vmatmul.mubr.f32.gmra.mxu0 %v1664_v48 }
 0x93a   :  { %v1669_v51 = vadd.f32 %v2035_v21, %v1668_v50 }
 0x93c   :  { %3034 = vmatprep.mubr.f32.mxu0 %v1669_v51 }
 0x93d   :  { %3035 = vmatmul.mubr.f32.gmra.mxu0 %v1674_v52 }
 0x9e1   :  { %v3015_v53 = vpop.f32.mrf.mxu0 }
 0x9e3   :  { %v1760_v54 = vpop.f32.mrf.mxu0 }
 0x9e5   :  { %v3018_v55 = vpop.f32.mrf.mxu0 }
 0x9e7   :  { %v1770_v56 = vpop.f32.mrf.mxu0 }
 0x9e9   :  { %v3021_v57 = vpop.f32.mrf.mxu0 }
 0x9eb   :  { %v1780_v58 = vpop.f32.mrf.mxu0 }
 0x9ed   :  { %v3024_v32 = vpop.f32.mrf.mxu0 }
 0x9ef   :  { %v1790_v59 = vpop.f32.mrf.mxu0 }
 0x9f1   :  { %v3027_v60 = vpop.f32.mrf.mxu0 }
 0x9f3   :  { %v1800_v61 = vpop.f32.mrf.mxu0 }
 0x9f5   :  { %v3030_v13 = vpop.f32.mrf.mxu0 }
 0x9f7   :  { %v1810_v63 = vpop.f32.mrf.mxu0 }
 0x9f9   :  { %v3033_v0 = vpop.f32.mrf.mxu0 }
 0x9fb   :  { %v1820_v17 = vpop.f32.mrf.mxu0 }
 0x9fd   :  { %v3036_v18 = vpop.f32.mrf.mxu0 }
 0x9fe   :  { %3037 = vmatprep.subr.mxu1 %v3036_v18 }
 0x9ff   :  { %v1830_v19 = vpop.f32.mrf.mxu0  ;;  %3038 = vmatpush3.msra.mxu1 %v3036_v18 }
 0xa00   :  { %3039 = vmatprep.subr.mxu1 %v1830_v19 }
 0xa01   :  { %3040 = vmatpush3.msra.mxu1 %v1830_v19 }
 0xa02   :  { %3041 = vmatprep.subr.mxu1 %v3033_v0 }
 0xa03   :  { %3042 = vmatpush3.msra.mxu1 %v3033_v0 }
 0xa04   :  { %3043 = vmatprep.subr.mxu1 %v1820_v17 }
 0xa05   :  { %3044 = vmatpush3.msra.mxu1 %v1820_v17 }
 0xa06   :  { %3045 = vmatprep.subr.mxu1 %v3030_v13 }
 0xa07   :  { %3046 = vmatpush3.msra.mxu1 %v3030_v13 }
 0xa08   :  { %3047 = vmatprep.subr.mxu1 %v1810_v63 }
 0xa09   :  { %3048 = vmatpush3.msra.mxu1 %v1810_v63 }
 0xa0a   :  { %3049 = vmatprep.subr.mxu1 %v3027_v60 }
 0xa0b   :  { %3050 = vmatpush3.msra.mxu1 %v3027_v60 }
 0xa0c   :  { %3051 = vmatprep.subr.mxu1 %v1800_v61 }
 0xa0d   :  { %3052 = vmatpush3.msra.mxu1 %v1800_v61 }
 0xa0e   :  { %3053 = vmatprep.subr.mxu1 %v3024_v32 }
 0xa0f   :  { %3054 = vmatpush3.msra.mxu1 %v3024_v32 }
 0xa10   :  { %3055 = vmatprep.subr.mxu1 %v1790_v59 }
 0xa11   :  { %3056 = vmatpush3.msra.mxu1 %v1790_v59 }
 0xa12   :  { %3057 = vmatprep.subr.mxu1 %v3021_v57 }
 0xa13   :  { %3058 = vmatpush3.msra.mxu1 %v3021_v57 }
 0xa14   :  { %3059 = vmatprep.subr.mxu1 %v1780_v58 }
 0xa15   :  { %3060 = vmatpush3.msra.mxu1 %v1780_v58 }
 0xa16   :  { %3061 = vmatprep.subr.mxu1 %v3018_v55 }
 0xa17   :  { %3062 = vmatpush3.msra.mxu1 %v3018_v55 }
 0xa18   :  { %3063 = vmatprep.subr.mxu1 %v1770_v56 }
 0xa19   :  { %3064 = vmatpush3.msra.mxu1 %v1770_v56 }
 0xa1a   :  { %3065 = vmatprep.subr.mxu1 %v3015_v53 }
 0xa1b   :  { %3066 = vmatpush3.msra.mxu1 %v3015_v53 }
 0xa1c   :  { %3067 = vmatprep.subr.mxu1 %v1760_v54 }
 0xa1d   :  { %3068 = vmatpush3.msra.mxu1 %v1760_v54 }
 0xa1e   :  { %3070 = vmatmul.mubr.f32.vlgmr.msra.gmra.mxu1 %v3347_v1  ;;  %v2036_v1 = vld [vmem:[#allocation7 + $0x5] ss:$0 sm:$0xff] }
 0xa1f   :  { %3072 = vmatprep.mubr.f32.mxu1 %v3350_v2 }
 0xa22   :  { %3073 = vmatmul.mubr.f32.gmra.mxu1 %v3353_v3 }
 0xa23   :  { %3075 = vmatprep.mubr.f32.mxu1 %v3356_v4 }
 0xa26   :  { %3076 = vmatmul.mubr.f32.gmra.mxu1 %v3359_v5 }
 0xa27   :  { %3078 = vmatprep.mubr.f32.mxu1 %v3362_v6 }
 0xa2a   :  { %3079 = vmatmul.mubr.f32.gmra.mxu1 %v3365_v7 }
 0xa2b   :  { %3081 = vmatprep.mubr.f32.mxu1 %v3368_v8 }
 0xa2e   :  { %3082 = vmatmul.mubr.f32.gmra.mxu1 %v3371_v9 }
 0xa2f   :  { %3084 = vmatprep.mubr.f32.mxu1 %v3374_v10 }
 0xa32   :  { %3085 = vmatmul.mubr.f32.gmra.mxu1 %v3377_v11 }
 0xa33   :  { %3087 = vmatprep.mubr.f32.mxu1 %v3380_v12 }
 0xa36   :  { %3088 = vmatmul.mubr.f32.gmra.mxu1 %v3383_v14 }
 0xa37   :  { %3090 = vmatprep.mubr.f32.mxu1 %v3386_v15 }
 0xa3a   :  { %3091 = vmatmul.mubr.f32.gmra.mxu1 %v3389_v16 }
 0xade   :  { %v3071_v2 = vpop.f32.mrf.mxu1 }
 0xadf   :  { %v1919_v3 = vadd.f32 %v3071_v2, %v2036_v1 }
 0xae0   :  { %v1913_v4 = vpop.f32.mrf.mxu1 }
 0xae1   :  { %v1993_v5 = vand.u32 2147483647, %v1919_v3  ;;  %v1914_v6 = vadd.f32 %v2036_v1, %v1913_v4 }
 0xae2   :  { %v3074_v7 = vpop.f32.mrf.mxu1 }
 0xae3   :  { %2009 = vst [vmem:[%s3460_s4 + $0x8] sm:$0xff] %v1993_v5  ;;  %v1992_v8 = vand.u32 2147483647, %v1914_v6  ;;  %v1929_v9 = vadd.f32 %v3074_v7, %v2036_v1 }
 0xae4   :  { %v1923_v10 = vpop.f32.mrf.mxu1 }
 0xae5   :  { %2008 = vst [vmem:[%s3460_s4] sm:$0xff] %v1992_v8  ;;  %v1995_v11 = vand.u32 2147483647, %v1929_v9  ;;  %v1924_v12 = vadd.f32 %v2036_v1, %v1923_v10 }
 0xae6   :  { %v3077_v14 = vpop.f32.mrf.mxu1 }
 0xae7   :  { %2011 = vst [vmem:[%s3460_s4 + $0x18] sm:$0xff] %v1995_v11  ;;  %v1994_v15 = vand.u32 2147483647, %v1924_v12  ;;  %v1939_v16 = vadd.f32 %v3077_v14, %v2036_v1 }
 0xae8   :  { %v1933_v20 = vpop.f32.mrf.mxu1 }
 0xae9   :  { %2010 = vst [vmem:[%s3460_s4 + $0x10] sm:$0xff] %v1994_v15  ;;  %v1997_v21 = vand.u32 2147483647, %v1939_v16  ;;  %v1934_v22 = vadd.f32 %v2036_v1, %v1933_v20 }
 0xaea   :  { %v3080_v23 = vpop.f32.mrf.mxu1 }
 0xaeb   :  { %2013 = vst [vmem:[%s3460_s4 + $0x28] sm:$0xff] %v1997_v21  ;;  %v1996_v24 = vand.u32 2147483647, %v1934_v22  ;;  %v1949_v25 = vadd.f32 %v3080_v23, %v2036_v1 }
 0xaec   :  { %v1943_v26 = vpop.f32.mrf.mxu1 }
 0xaed   :  { %2012 = vst [vmem:[%s3460_s4 + $0x20] sm:$0xff] %v1996_v24  ;;  %v1999_v27 = vand.u32 2147483647, %v1949_v25  ;;  %v1944_v62 = vadd.f32 %v2036_v1, %v1943_v26 }
 0xaee   :  { %v3083_v28 = vpop.f32.mrf.mxu1 }
 0xaef   :  { %2015 = vst [vmem:[%s3460_s4 + $0x38] sm:$0xff] %v1999_v27  ;;  %v1998_v29 = vand.u32 2147483647, %v1944_v62  ;;  %v1959_v30 = vadd.f32 %v3083_v28, %v2036_v1 }
 0xaf0   :  { %v1953_v31 = vpop.f32.mrf.mxu1 }
 0xaf1   :  { %2014 = vst [vmem:[%s3460_s4 + $0x30] sm:$0xff] %v1998_v29  ;;  %v2001_v33 = vand.u32 2147483647, %v1959_v30  ;;  %v1954_v34 = vadd.f32 %v2036_v1, %v1953_v31 }
 0xaf2   :  { %v3086_v35 = vpop.f32.mrf.mxu1 }
 0xaf3   :  { %2017 = vst [vmem:[%s3460_s4 + $0x48] sm:$0xff] %v2001_v33  ;;  %v2000_v36 = vand.u32 2147483647, %v1954_v34  ;;  %v1969_v37 = vadd.f32 %v3086_v35, %v2036_v1 }
 0xaf4   :  { %v1963_v38 = vpop.f32.mrf.mxu1 }
 0xaf5   :  { %2016 = vst [vmem:[%s3460_s4 + $0x40] sm:$0xff] %v2000_v36  ;;  %v2003_v39 = vand.u32 2147483647, %v1969_v37  ;;  %v1964_v40 = vadd.f32 %v2036_v1, %v1963_v38 }
 0xaf6   :  { %v3089_v41 = vpop.f32.mrf.mxu1 }
 0xaf7   :  { %2019 = vst [vmem:[%s3460_s4 + $0x58] sm:$0xff] %v2003_v39  ;;  %v2002_v42 = vand.u32 2147483647, %v1964_v40  ;;  %v1979_v43 = vadd.f32 %v3089_v41, %v2036_v1 }
 0xaf8   :  { %v1973_v44 = vpop.f32.mrf.mxu1 }
 0xaf9   :  { %2018 = vst [vmem:[%s3460_s4 + $0x50] sm:$0xff] %v2002_v42  ;;  %v2005_v45 = vand.u32 2147483647, %v1979_v43  ;;  %v1974_v46 = vadd.f32 %v2036_v1, %v1973_v44 }
 0xafa   :  { %v3092_v47 = vpop.f32.mrf.mxu1 }
 0xafb   :  { %2021 = vst [vmem:[%s3460_s4 + $0x68] sm:$0xff] %v2005_v45  ;;  %v2004_v48 = vand.u32 2147483647, %v1974_v46  ;;  %v1989_v49 = vadd.f32 %v3092_v47, %v2036_v1 }
 0xafc   :  { %v1983_v50 = vpop.f32.mrf.mxu1 }
 0xafd   :  { %2020 = vst [vmem:[%s3460_s4 + $0x60] sm:$0xff] %v2004_v48  ;;  %v2007_v51 = vand.u32 2147483647, %v1989_v49  ;;  %v1984_v52 = vadd.f32 %v2036_v1, %v1983_v50 }
 0xaff   :  { %2023 = vst [vmem:[%s3460_s4 + $0x78] sm:$0xff] %v2007_v51  ;;  %v2006_v53 = vand.u32 2147483647, %v1984_v52 }
 0xb01   :  { %2022 = vst [vmem:[%s3460_s4 + $0x70] sm:$0xff] %v2006_v53 }
 0xb02   :  { %2028 = vsyncpa [#allocation3], 1 }
 0xb03   :  { %2029 = vsyncpa [#allocation5], 1 }
 0xb04   :  { %2030 = vsyncpa [#allocation8], 1 }

</bundles_post_ra>
